<compile_context>
chip_gen: v7x
topology: tpu7x:2x2x1
jax: 0.10.0
libtpu: 0.0.40
codegen_flags: <defaults>
</compile_context>

<pallas_src>
import math
import functools

import jax
import jax.numpy as jnp
import numpy as np
from jax.experimental import pallas as pl
from jax.experimental.pallas import tpu as pltpu


# ----------------------------- kernel helpers -----------------------------

def _layernorm(x, gamma, beta, eps=1e-5):
    # matches torch.nn.LayerNorm (biased variance, eps inside sqrt)
    mean = jnp.mean(x, axis=-1, keepdims=True)
    var = jnp.mean((x - mean) ** 2, axis=-1, keepdims=True)
    return (x - mean) * jax.lax.rsqrt(var + eps) * gamma + beta


def _new_gelu(x):
    c = math.sqrt(2.0 / math.pi)
    return 0.5 * x * (1.0 + jnp.tanh(c * (x + 0.044715 * x * x * x)))


# ------------------------------- the kernel -------------------------------

def block_kernel(x_ref,
                 ln1_g_ref, ln1_b_ref,
                 w_q_ref, b_q_ref, w_k_ref, b_k_ref, w_v_ref, b_v_ref,
                 w_ao_ref, b_ao_ref,
                 ln2_g_ref, ln2_b_ref,
                 w_fc_ref, b_fc_ref, w_mo_ref, b_mo_ref,
                 out_ref,
                 k_scratch, v_scratch,
                 *, n_head):
    TQ, C = x_ref.shape               # current query tile
    H = n_head
    hd = C // H
    qi = pl.program_id(1)
    q0 = pl.multiple_of(qi * TQ, TQ)

    x_q = x_ref[...]                                          # (TQ, C) fp32

    # ------------ shared LayerNorm for Q / K / V projections ------------
    h_q = _layernorm(x_q, ln1_g_ref[...], ln1_b_ref[...])
    hb = h_q.astype(jnp.bfloat16)

    # ---- incremental K/V projection: only the TQ new rows of this tile,
    #      appended into the persistent head-major (H, T, hd) scratch ----
    k_new = jnp.dot(hb, w_k_ref[...],
                    preferred_element_type=jnp.float32) + b_k_ref[...]
    v_new = jnp.dot(hb, w_v_ref[...],
                    preferred_element_type=jnp.float32) + b_v_ref[...]
    k_scratch[:, pl.ds(q0, TQ), :] = jnp.transpose(
        k_new.reshape(TQ, H, hd), (1, 0, 2)).astype(jnp.bfloat16)
    v_scratch[:, pl.ds(q0, TQ), :] = jnp.transpose(
        v_new.reshape(TQ, H, hd), (1, 0, 2)).astype(jnp.bfloat16)

    # ---------------- Q projection (1/sqrt(hd) folded in) ----------------
    q = jnp.dot(hb, w_q_ref[...],
                preferred_element_type=jnp.float32) + b_q_ref[...]  # (TQ,C)
    qh = jnp.transpose(q.reshape(TQ, H, hd),
                       (1, 0, 2)).astype(jnp.bfloat16)              # (H,TQ,hd)

    # -------- flash-style causal loop over KV tiles j = 0 .. qi ----------
    neg = -1e30
    row_ids = q0 + jax.lax.broadcasted_iota(jnp.int32, (TQ, TQ), 0)
    col_loc = jax.lax.broadcasted_iota(jnp.int32, (TQ, TQ), 1)

    def kv_step(j, carry):
        m, l, acc = carry
        k0 = pl.multiple_of(j * TQ, TQ)
        k_t = k_scratch[:, pl.ds(k0, TQ), :]                 # (H,TQ,hd) bf16
        v_t = v_scratch[:, pl.ds(k0, TQ), :]                 # (H,TQ,hd) bf16
        s = jnp.einsum('hqd,hkd->hqk', qh, k_t,
                       preferred_element_type=jnp.float32)   # (H,TQ,TQ)
        mask = row_ids >= (k0 + col_loc)
        s = jnp.where(mask[None, :, :], s, neg)
        m_new = jnp.maximum(m, jnp.max(s, axis=-1, keepdims=True))
        alpha = jnp.exp(m - m_new)
        p = jnp.exp(s - m_new)                               # un-normalized
        l = alpha * l + jnp.sum(p, axis=-1, keepdims=True)
        acc = alpha * acc + jnp.einsum('hqk,hkd->hqd',
                                       p.astype(jnp.bfloat16), v_t,
                                       preferred_element_type=jnp.float32)
        return m_new, l, acc

    m0 = jnp.full((H, TQ, 1), neg, jnp.float32)
    l0 = jnp.zeros((H, TQ, 1), jnp.float32)
    a0 = jnp.zeros((H, TQ, hd), jnp.float32)
    m, l, acc = jax.lax.fori_loop(0, qi + 1, kv_step, (m0, l0, a0))

    # deferred normalization on the small (H, TQ, hd) accumulator
    y = acc * pl.reciprocal(l, approx=True)                  # (H, TQ, hd)
    y = jnp.transpose(y, (1, 0, 2)).reshape(TQ, C)           # (TQ, C)

    attn_out = jnp.dot(y.astype(jnp.bfloat16), w_ao_ref[...],
                       preferred_element_type=jnp.float32) + b_ao_ref[...]
    xr = x_q + attn_out

    # ------------------- MLP branch: x + mlpf(ln_2(x)) -------------------
    h2 = _layernorm(xr, ln2_g_ref[...], ln2_b_ref[...])
    fc = jnp.dot(h2.astype(jnp.bfloat16), w_fc_ref[...],
                 preferred_element_type=jnp.float32) + b_fc_ref[...]
    act = _new_gelu(fc)
    mlp = jnp.dot(act.astype(jnp.bfloat16), w_mo_ref[...],
                  preferred_element_type=jnp.float32) + b_mo_ref[...]

    out_ref[...] = xr + mlp


# ------------------------------ host wrapper ------------------------------

def _vmem_limit_bytes():
    # Per-generation budget: ~3/4 of physical VMEM (48 MiB on v7x,
    # 96 MiB on v5e/v6e) so compiler-internal scratch keeps headroom.
    try:
        cap = int(pltpu.get_tpu_info().vmem_capacity_bytes)
    except Exception:
        cap = 64 * 1024 * 1024
    return cap * 3 // 4


def _pick_tq(T, C, n_head, vmem_budget):
    # Prefer 256 (matches v6e/v7x 256x256 MXU M-dim), but only if the rough
    # per-step fp32 live set (x/out tiles, softmax state + score tile, MLP
    # temporaries) fits in ~half the VMEM budget (rest: weights + K/V scratch).
    hd = C // n_head
    divisors = [c for c in (256, 128, 64, 32, 16, 8) if c <= T and T % c == 0]
    if not divisors:
        return T
    for cand in divisors:
        est = 4 * (4 * cand * C
                   + n_head * cand * (hd + 2)
                   + n_head * cand * cand
                   + 2 * cand * 4 * C)
        if est <= vmem_budget // 2:
            return cand
    return divisors[-1]


def transformer_block(x, params, n_head):
    B, T, C = x.shape
    assert C % n_head == 0
    hd = C // n_head
    scale = 1.0 / math.sqrt(hd)
    bf16 = jnp.bfloat16

    # ---- host-side weight prep: split qkv, fold attention scale into Q,
    #      cast matmul weights to bf16 (halves HBM/VMEM traffic) ----
    w_qkv, b_qkv = params["w_qkv"], params["b_qkv"]
    w_q = (w_qkv[:, 0 * C:1 * C] * scale).astype(bf16)
    w_k = w_qkv[:, 1 * C:2 * C].astype(bf16)
    w_v = w_qkv[:, 2 * C:3 * C].astype(bf16)
    b_q = b_qkv[:, 0 * C:1 * C] * scale
    b_k = b_qkv[:, 1 * C:2 * C]
    b_v = b_qkv[:, 2 * C:3 * C]

    weights = [
        params["ln1_g"], params["ln1_b"],
        w_q, b_q, w_k, b_k, w_v, b_v,
        params["w_ao"].astype(bf16), params["b_ao"],
        params["ln2_g"], params["ln2_b"],
        params["w_fc"].astype(bf16), params["b_fc"],
        params["w_mo"].astype(bf16), params["b_mo"],
    ]

    vmem_limit = _vmem_limit_bytes()
    TQ = _pick_tq(T, C, n_head, vmem_limit)
    NQ = T // TQ

    # x is fed tile-by-tile (NOT the full sequence): causality + sequential
    # qi steps mean the K/V rows needed by tile qi were projected at steps
    # <= qi of the SAME batch element into the persistent VMEM scratch.
    in_specs = [pl.BlockSpec((None, TQ, C), lambda b, qi: (b, qi, 0))]
    in_specs += [pl.BlockSpec(w.shape, lambda b, qi: (0, 0)) for w in weights]

    grid_spec = pltpu.PrefetchScalarGridSpec(
        num_scalar_prefetch=0,
        grid=(B, NQ),
        in_specs=in_specs,
        out_specs=pl.BlockSpec((None, TQ, C), lambda b, qi: (b, qi, 0)),
        scratch_shapes=[pltpu.VMEM((n_head, T, hd), jnp.bfloat16),   # K
                        pltpu.VMEM((n_head, T, hd), jnp.bfloat16)],  # V
    )

    # NOTE: correctness of the persistent K/V scratch REQUIRES the qi axis
    # to stay "arbitrary" (sequential, innermost) and only the batch axis to
    # be megacore-parallel. Do not reorder the grid or mark qi "parallel".
    return pl.pallas_call(
        functools.partial(block_kernel, n_head=n_head),
        out_shape=jax.ShapeDtypeStruct((B, T, C), jnp.float32),
        grid_spec=grid_spec,
        compiler_params=pltpu.CompilerParams(
            dimension_semantics=("parallel", "arbitrary"),
            vmem_limit_bytes=vmem_limit),
    )(x, *weights)


# -------------------- deterministic parameter creation --------------------

def init_params(key, n_embd):
    def linear(k, fan_in, fan_out):
        bound = 1.0 / math.sqrt(fan_in)
        kw, kb = jax.random.split(k)
        w = jax.random.uniform(kw, (fan_in, fan_out), jnp.float32, -bound, bound)
        b = jax.random.uniform(kb, (1, fan_out), jnp.float32, -bound, bound)
        return w, b

    k1, k2, k3, k4 = jax.random.split(key, 4)
    w_qkv, b_qkv = linear(k1, n_embd, 3 * n_embd)      # c_attn
    w_ao,  b_ao  = linear(k2, n_embd, n_embd)          # attn c_proj
    w_fc,  b_fc  = linear(k3, n_embd, 4 * n_embd)      # mlp c_fc
    w_mo,  b_mo  = linear(k4, 4 * n_embd, n_embd)      # mlp c_proj

    return dict(
        ln1_g=jnp.ones((1, n_embd), jnp.float32),
        ln1_b=jnp.zeros((1, n_embd), jnp.float32),
        w_qkv=w_qkv, b_qkv=b_qkv,
        w_ao=w_ao, b_ao=b_ao,
        ln2_g=jnp.ones((1, n_embd), jnp.float32),
        ln2_b=jnp.zeros((1, n_embd), jnp.float32),
        w_fc=w_fc, b_fc=b_fc,
        w_mo=w_mo, b_mo=b_mo,
    )


# ------------------------- pure-JAX reference check ------------------------

def block_reference(x, p, n_head):
    def ln(z, g, b):
        mu = jnp.mean(z, -1, keepdims=True)
        var = jnp.mean((z - mu) ** 2, -1, keepdims=True)
        return (z - mu) / jnp.sqrt(var + 1e-5) * g + b

    B, T, C = x.shape
    hd = C // n_head

    h = ln(x, p["ln1_g"], p["ln1_b"])
    qkv = h @ p["w_qkv"] + p["b_qkv"]
    q, k, v = jnp.split(qkv, 3, axis=-1)
    q = q.reshape(B, T, n_head, hd).transpose(0, 2, 1, 3)
    k = k.reshape(B, T, n_head, hd).transpose(0, 2, 1, 3)
    v = v.reshape(B, T, n_head, hd).transpose(0, 2, 1, 3)
    att = (q @ jnp.swapaxes(k, -2, -1)) / math.sqrt(hd)
    mask = jnp.tril(jnp.ones((T, T), bool))
    att = jnp.where(mask, att, -jnp.inf)
    att = jax.nn.softmax(att, axis=-1)
    y = (att @ v).transpose(0, 2, 1, 3).reshape(B, T, C)
    x = x + (y @ p["w_ao"] + p["b_ao"])

    h2 = ln(x, p["ln2_g"], p["ln2_b"])
    fc = h2 @ p["w_fc"] + p["b_fc"]
    c = math.sqrt(2.0 / math.pi)
    act = 0.5 * fc * (1.0 + jnp.tanh(c * (fc + 0.044715 * fc ** 3)))
    return x + (act @ p["w_mo"] + p["b_mo"])


# ---------------------------------- main -----------------------------------

if __name__ == "__main__":
    B, T, C, n_head = 2, 8, 32, 4        # block_size = T

    key = jax.random.PRNGKey(0)
    kx, kp = jax.random.split(key)
    x = jax.random.normal(kx, (B, T, C), jnp.float32)
    params = init_params(kp, C)

    out = jax.block_until_ready(transformer_block(x, params, n_head))
    ref = jax.block_until_ready(block_reference(x, params, n_head))

    # bf16 matmul operands (fp32 accumulation) vs fp32 reference
    np.testing.assert_allclose(np.asarray(out), np.asarray(ref),
                               rtol=2e-2, atol=2e-2)

    print("KERNEL_OK")
</pallas_src>

<mosaic_0001>
module attributes {stable_mosaic.version = 11 : i64} {
  func.func @block_kernel(%arg0: i32, %arg1: i32, %arg2: memref<1x8x32xf32, #tpu.memory_space<vmem>>, %arg3: memref<1x32xf32, #tpu.memory_space<vmem>>, %arg4: memref<1x32xf32, #tpu.memory_space<vmem>>, %arg5: memref<32x32xbf16, #tpu.memory_space<vmem>>, %arg6: memref<1x32xf32, #tpu.memory_space<vmem>>, %arg7: memref<32x32xbf16, #tpu.memory_space<vmem>>, %arg8: memref<1x32xf32, #tpu.memory_space<vmem>>, %arg9: memref<32x32xbf16, #tpu.memory_space<vmem>>, %arg10: memref<1x32xf32, #tpu.memory_space<vmem>>, %arg11: memref<32x32xbf16, #tpu.memory_space<vmem>>, %arg12: memref<1x32xf32, #tpu.memory_space<vmem>>, %arg13: memref<1x32xf32, #tpu.memory_space<vmem>>, %arg14: memref<1x32xf32, #tpu.memory_space<vmem>>, %arg15: memref<32x128xbf16, #tpu.memory_space<vmem>>, %arg16: memref<1x128xf32, #tpu.memory_space<vmem>>, %arg17: memref<128x32xbf16, #tpu.memory_space<vmem>>, %arg18: memref<1x32xf32, #tpu.memory_space<vmem>>, %arg19: memref<1x8x32xf32, #tpu.memory_space<vmem>>, %arg20: memref<4x8x8xbf16, #tpu.memory_space<vmem>>, %arg21: memref<4x8x8xbf16, #tpu.memory_space<vmem>>) attributes {dimension_semantics = [#tpu.dimension_semantics<parallel>, #tpu.dimension_semantics<arbitrary>], iteration_bounds = array<i64: 2, 1>, scalar_prefetch = 0 : i64, scratch_operands = 2 : i64, tpu.core_type = #tpu.core_type<tc>, window_params = [{transform_indices = @transform_0, window_bounds = array<i64: 1, 8, 32>}, {pipeline_mode = #tpu.pipeline_mode<synchronous>, transform_indices = @transform_1, window_bounds = array<i64: 1, 32>}, {pipeline_mode = #tpu.pipeline_mode<synchronous>, transform_indices = @transform_2, window_bounds = array<i64: 1, 32>}, {pipeline_mode = #tpu.pipeline_mode<synchronous>, transform_indices = @transform_3, window_bounds = array<i64: 32, 32>}, {pipeline_mode = #tpu.pipeline_mode<synchronous>, transform_indices = @transform_4, window_bounds = array<i64: 1, 32>}, {pipeline_mode = #tpu.pipeline_mode<synchronous>, transform_indices = @transform_5, window_bounds = array<i64: 32, 32>}, {pipeline_mode = #tpu.pipeline_mode<synchronous>, transform_indices = @transform_6, window_bounds = array<i64: 1, 32>}, {pipeline_mode = #tpu.pipeline_mode<synchronous>, transform_indices = @transform_7, window_bounds = array<i64: 32, 32>}, {pipeline_mode = #tpu.pipeline_mode<synchronous>, transform_indices = @transform_8, window_bounds = array<i64: 1, 32>}, {pipeline_mode = #tpu.pipeline_mode<synchronous>, transform_indices = @transform_9, window_bounds = array<i64: 32, 32>}, {pipeline_mode = #tpu.pipeline_mode<synchronous>, transform_indices = @transform_10, window_bounds = array<i64: 1, 32>}, {pipeline_mode = #tpu.pipeline_mode<synchronous>, transform_indices = @transform_11, window_bounds = array<i64: 1, 32>}, {pipeline_mode = #tpu.pipeline_mode<synchronous>, transform_indices = @transform_12, window_bounds = array<i64: 1, 32>}, {pipeline_mode = #tpu.pipeline_mode<synchronous>, transform_indices = @transform_13, window_bounds = array<i64: 32, 128>}, {pipeline_mode = #tpu.pipeline_mode<synchronous>, transform_indices = @transform_14, window_bounds = array<i64: 1, 128>}, {pipeline_mode = #tpu.pipeline_mode<synchronous>, transform_indices = @transform_15, window_bounds = array<i64: 128, 32>}, {pipeline_mode = #tpu.pipeline_mode<synchronous>, transform_indices = @transform_16, window_bounds = array<i64: 1, 32>}, {transform_indices = @transform_17, window_bounds = array<i64: 1, 8, 32>}]} {
    %c8_i32 = arith.constant 8 : i32
    %0 = arith.muli %arg1, %c8_i32 : i32
    %1 = tpu.assume_multiple %0, 8 : i32
    %c0 = arith.constant 0 : index
    %c0_0 = arith.constant 0 : index
    %c0_1 = arith.constant 0 : index
    %2 = vector.load %arg2[%c0, %c0_0, %c0_1] : memref<1x8x32xf32, #tpu.memory_space<vmem>>, vector<1x8x32xf32>
    %3 = vector.shape_cast %2 : vector<1x8x32xf32> to vector<8x32xf32>
    %c0_2 = arith.constant 0 : index
    %c0_3 = arith.constant 0 : index
    %4 = vector.load %arg3[%c0_2, %c0_3] : memref<1x32xf32, #tpu.memory_space<vmem>>, vector<1x32xf32>
    %c0_4 = arith.constant 0 : index
    %c0_5 = arith.constant 0 : index
    %5 = vector.load %arg4[%c0_4, %c0_5] : memref<1x32xf32, #tpu.memory_space<vmem>>, vector<1x32xf32>
    %cst = arith.constant dense<0.000000e+00> : vector<8xf32>
    %6 = vector.multi_reduction <add>, %3, %cst [1] : vector<8x32xf32> to vector<8xf32>
    %7 = vector.shape_cast %6 : vector<8xf32> to vector<8x1xf32>
    %cst_6 = arith.constant 3.200000e+01 : f32
    %8 = vector.broadcast %cst_6 : f32 to vector<8x1xf32>
    %9 = arith.divf %7, %8 : vector<8x1xf32>
    %10 = vector.broadcast %9 : vector<8x1xf32> to vector<8x32xf32>
    %11 = arith.subf %3, %10 : vector<8x32xf32>
    %12 = arith.mulf %11, %11 : vector<8x32xf32>
    %cst_7 = arith.constant dense<0.000000e+00> : vector<8xf32>
    %13 = vector.multi_reduction <add>, %12, %cst_7 [1] : vector<8x32xf32> to vector<8xf32>
    %14 = vector.shape_cast %13 : vector<8xf32> to vector<8x1xf32>
    %cst_8 = arith.constant 3.200000e+01 : f32
    %15 = vector.broadcast %cst_8 : f32 to vector<8x1xf32>
    %16 = arith.divf %14, %15 : vector<8x1xf32>
    %17 = vector.broadcast %9 : vector<8x1xf32> to vector<8x32xf32>
    %18 = arith.subf %3, %17 : vector<8x32xf32>
    %cst_9 = arith.constant 9.99999974E-6 : f32
    %19 = vector.broadcast %cst_9 : f32 to vector<8x1xf32>
    %20 = arith.addf %16, %19 : vector<8x1xf32>
    %21 = math.rsqrt %20 : vector<8x1xf32>
    %22 = vector.broadcast %21 : vector<8x1xf32> to vector<8x32xf32>
    %23 = arith.mulf %18, %22 : vector<8x32xf32>
    %24 = vector.broadcast %4 : vector<1x32xf32> to vector<8x32xf32>
    %25 = arith.mulf %23, %24 : vector<8x32xf32>
    %26 = vector.broadcast %5 : vector<1x32xf32> to vector<8x32xf32>
    %27 = arith.addf %25, %26 : vector<8x32xf32>
    %28 = arith.truncf %27 : vector<8x32xf32> to vector<8x32xbf16>
    %c0_10 = arith.constant 0 : index
    %c0_11 = arith.constant 0 : index
    %29 = vector.load %arg7[%c0_10, %c0_11] : memref<32x32xbf16, #tpu.memory_space<vmem>>, vector<32x32xbf16>
    %cst_12 = arith.constant dense<0.000000e+00> : vector<8x32xf32>
    %30 = tpu.matmul %28, %29, %cst_12 {dimension_numbers = #tpu.dot_dimension_numbers<[1], [0], [0], [1], [0, 0, 1, 1], [], []>} : vector<8x32xbf16>, vector<32x32xbf16>, vector<8x32xf32> -> vector<8x32xf32>
    %c0_13 = arith.constant 0 : index
    %c0_14 = arith.constant 0 : index
    %31 = vector.load %arg8[%c0_13, %c0_14] : memref<1x32xf32, #tpu.memory_space<vmem>>, vector<1x32xf32>
    %32 = vector.broadcast %31 : vector<1x32xf32> to vector<8x32xf32>
    %33 = arith.addf %30, %32 : vector<8x32xf32>
    %c0_15 = arith.constant 0 : index
    %c0_16 = arith.constant 0 : index
    %34 = vector.load %arg9[%c0_15, %c0_16] : memref<32x32xbf16, #tpu.memory_space<vmem>>, vector<32x32xbf16>
    %cst_17 = arith.constant dense<0.000000e+00> : vector<8x32xf32>
    %35 = tpu.matmul %28, %34, %cst_17 {dimension_numbers = #tpu.dot_dimension_numbers<[1], [0], [0], [1], [0, 0, 1, 1], [], []>} : vector<8x32xbf16>, vector<32x32xbf16>, vector<8x32xf32> -> vector<8x32xf32>
    %c0_18 = arith.constant 0 : index
    %c0_19 = arith.constant 0 : index
    %36 = vector.load %arg10[%c0_18, %c0_19] : memref<1x32xf32, #tpu.memory_space<vmem>>, vector<1x32xf32>
    %37 = vector.broadcast %36 : vector<1x32xf32> to vector<8x32xf32>
    %38 = arith.addf %35, %37 : vector<8x32xf32>
    %39 = vector.shape_cast %33 : vector<8x32xf32> to vector<8x4x8xf32>
    %40 = tpu.transpose %39, [1, 0, 2] : vector<8x4x8xf32> -> vector<4x8x8xf32>
    %41 = arith.truncf %40 : vector<4x8x8xf32> to vector<4x8x8xbf16>
    %c0_20 = arith.constant 0 : index
    %42 = arith.index_cast %1 : i32 to index
    %c0_21 = arith.constant 0 : index
    %43 = vector.load %arg20[%c0_20, %42, %c0_21] : memref<4x8x8xbf16, #tpu.memory_space<vmem>>, vector<4x8x8xbf16>
    tpu.vector_store %arg20[%c0_20, %42, %c0_21], %41 {strides = array<i32>} : memref<4x8x8xbf16, #tpu.memory_space<vmem>>, vector<4x8x8xbf16>,
    %44 = vector.shape_cast %38 : vector<8x32xf32> to vector<8x4x8xf32>
    %45 = tpu.transpose %44, [1, 0, 2] : vector<8x4x8xf32> -> vector<4x8x8xf32>
    %46 = arith.truncf %45 : vector<4x8x8xf32> to vector<4x8x8xbf16>
    %c0_22 = arith.constant 0 : index
    %47 = arith.index_cast %1 : i32 to index
    %c0_23 = arith.constant 0 : index
    %48 = vector.load %arg21[%c0_22, %47, %c0_23] : memref<4x8x8xbf16, #tpu.memory_space<vmem>>, vector<4x8x8xbf16>
    tpu.vector_store %arg21[%c0_22, %47, %c0_23], %46 {strides = array<i32>} : memref<4x8x8xbf16, #tpu.memory_space<vmem>>, vector<4x8x8xbf16>,
    %c0_24 = arith.constant 0 : index
    %c0_25 = arith.constant 0 : index
    %49 = vector.load %arg5[%c0_24, %c0_25] : memref<32x32xbf16, #tpu.memory_space<vmem>>, vector<32x32xbf16>
    %cst_26 = arith.constant dense<0.000000e+00> : vector<8x32xf32>
    %50 = tpu.matmul %28, %49, %cst_26 {dimension_numbers = #tpu.dot_dimension_numbers<[1], [0], [0], [1], [0, 0, 1, 1], [], []>} : vector<8x32xbf16>, vector<32x32xbf16>, vector<8x32xf32> -> vector<8x32xf32>
    %c0_27 = arith.constant 0 : index
    %c0_28 = arith.constant 0 : index
    %51 = vector.load %arg6[%c0_27, %c0_28] : memref<1x32xf32, #tpu.memory_space<vmem>>, vector<1x32xf32>
    %52 = vector.broadcast %51 : vector<1x32xf32> to vector<8x32xf32>
    %53 = arith.addf %50, %52 : vector<8x32xf32>
    %54 = vector.shape_cast %53 : vector<8x32xf32> to vector<8x4x8xf32>
    %55 = tpu.transpose %54, [1, 0, 2] : vector<8x4x8xf32> -> vector<4x8x8xf32>
    %56 = arith.truncf %55 : vector<4x8x8xf32> to vector<4x8x8xbf16>
    %57 = tpu.iota {dimensions = array<i32: 0>} : vector<8x8xi32>
    %58 = vector.broadcast %1 : i32 to vector<8x8xi32>
    %59 = arith.addi %58, %57 : vector<8x8xi32>
    %60 = tpu.iota {dimensions = array<i32: 1>} : vector<8x8xi32>
    %cst_29 = arith.constant -1.000000e+30 : f32
    %61 = vector.broadcast %cst_29 : f32 to vector<4x8x1xf32>
    %cst_30 = arith.constant 0.000000e+00 : f32
    %62 = vector.broadcast %cst_30 : f32 to vector<4x8x1xf32>
    %cst_31 = arith.constant 0.000000e+00 : f32
    %63 = vector.broadcast %cst_31 : f32 to vector<4x8x8xf32>
    %c1_i32 = arith.constant 1 : i32
    %64 = arith.addi %arg1, %c1_i32 : i32
    %c0_i32 = arith.constant 0 : i32
    %65 = arith.subi %64, %c0_i32 : i32
    %66 = arith.addi %c0_i32, %65 : i32
    %c1_i32_32 = arith.constant 1 : i32
    %67:3 = scf.for %arg22 = %c0_i32 to %66 step %c1_i32_32 iter_args(%arg23 = %61, %arg24 = %62, %arg25 = %63) -> (vector<4x8x1xf32>, vector<4x8x1xf32>, vector<4x8x8xf32>)  : i32 {
      %c8_i32_64 = arith.constant 8 : i32
      %133 = arith.muli %arg22, %c8_i32_64 : i32
      %134 = tpu.assume_multiple %133, 8 : i32
      %c0_65 = arith.constant 0 : index
      %135 = arith.index_cast %134 : i32 to index
      %c0_66 = arith.constant 0 : index
      %136 = vector.load %arg20[%c0_65, %135, %c0_66] : memref<4x8x8xbf16, #tpu.memory_space<vmem>>, vector<4x8x8xbf16>
      %c0_67 = arith.constant 0 : index
      %137 = arith.index_cast %134 : i32 to index
      %c0_68 = arith.constant 0 : index
      %138 = vector.load %arg21[%c0_67, %137, %c0_68] : memref<4x8x8xbf16, #tpu.memory_space<vmem>>, vector<4x8x8xbf16>
      "tpu.trace_start"() <{level = 10 : i32, message = "hqd,hkd->hqk"}> : () -> ()
      %cst_69 = arith.constant dense<0.000000e+00> : vector<4x8x8xf32>
      %139 = tpu.matmul %56, %136, %cst_69 {dimension_numbers = #tpu.dot_dimension_numbers<[2], [2], [1], [1], [0, 0, 0, 1, 1, 1], [0], [0]>} : vector<4x8x8xbf16>, vector<4x8x8xbf16>, vector<4x8x8xf32> -> vector<4x8x8xf32>
      "tpu.trace_stop"() : () -> ()
      %140 = vector.broadcast %134 : i32 to vector<8x8xi32>
      %141 = arith.addi %140, %60 : vector<8x8xi32>
      %142 = arith.cmpi sge, %59, %141 : vector<8x8xi32>
      %143 = vector.shape_cast %142 : vector<8x8xi1> to vector<1x8x8xi1>
      %cst_70 = arith.constant -1.000000e+30 : f32
      %144 = vector.shape_cast %143 : vector<1x8x8xi1> to vector<1x8x8xi1>
      %145 = vector.broadcast %144 : vector<1x8x8xi1> to vector<4x8x8xi1>
      %146 = vector.broadcast %cst_70 : f32 to vector<4x8x8xf32>
      %147 = arith.select %145, %139, %146 : vector<4x8x8xi1>, vector<4x8x8xf32>
      %cst_71 = arith.constant dense<0xFF800000> : vector<4x8xf32>
      %148 = vector.multi_reduction <maximumf>, %147, %cst_71 [2] : vector<4x8x8xf32> to vector<4x8xf32>
      %149 = vector.shape_cast %148 : vector<4x8xf32> to vector<4x8x1xf32>
      %150 = arith.maximumf %arg23, %149 : vector<4x8x1xf32>
      %151 = arith.subf %arg23, %150 : vector<4x8x1xf32>
      %152 = math.exp %151 : vector<4x8x1xf32>
      %153 = vector.broadcast %150 : vector<4x8x1xf32> to vector<4x8x8xf32>
      %154 = arith.subf %147, %153 : vector<4x8x8xf32>
      %155 = math.exp %154 : vector<4x8x8xf32>
      %156 = arith.mulf %152, %arg24 : vector<4x8x1xf32>
      %cst_72 = arith.constant dense<0.000000e+00> : vector<4x8xf32>
      %157 = vector.multi_reduction <add>, %155, %cst_72 [2] : vector<4x8x8xf32> to vector<4x8xf32>
      %158 = vector.shape_cast %157 : vector<4x8xf32> to vector<4x8x1xf32>
      %159 = arith.addf %156, %158 : vector<4x8x1xf32>
      %160 = vector.broadcast %152 : vector<4x8x1xf32> to vector<4x8x8xf32>
      %161 = arith.mulf %160, %arg25 : vector<4x8x8xf32>
      %162 = arith.truncf %155 : vector<4x8x8xf32> to vector<4x8x8xbf16>
      "tpu.trace_start"() <{level = 10 : i32, message = "hqk,hkd->hqd"}> : () -> ()
      %cst_73 = arith.constant dense<0.000000e+00> : vector<4x8x8xf32>
      %163 = tpu.matmul %162, %138, %cst_73 {dimension_numbers = #tpu.dot_dimension_numbers<[2], [1], [1], [2], [0, 0, 0, 1, 1, 2], [0], [0]>} : vector<4x8x8xbf16>, vector<4x8x8xbf16>, vector<4x8x8xf32> -> vector<4x8x8xf32>
      "tpu.trace_stop"() : () -> ()
      %164 = arith.addf %161, %163 : vector<4x8x8xf32>
      scf.yield %150, %159, %164 : vector<4x8x1xf32>, vector<4x8x1xf32>, vector<4x8x8xf32>
    }
    %68 = tpu.reciprocal %67#1 {approx = true} : vector<4x8x1xf32> -> vector<4x8x1xf32>
    %69 = vector.broadcast %68 : vector<4x8x1xf32> to vector<4x8x8xf32>
    %70 = arith.mulf %67#2, %69 : vector<4x8x8xf32>
    %71 = tpu.transpose %70, [1, 0, 2] : vector<4x8x8xf32> -> vector<8x4x8xf32>
    %72 = vector.shape_cast %71 : vector<8x4x8xf32> to vector<8x32xf32>
    %73 = arith.truncf %72 : vector<8x32xf32> to vector<8x32xbf16>
    %c0_33 = arith.constant 0 : index
    %c0_34 = arith.constant 0 : index
    %74 = vector.load %arg11[%c0_33, %c0_34] : memref<32x32xbf16, #tpu.memory_space<vmem>>, vector<32x32xbf16>
    %cst_35 = arith.constant dense<0.000000e+00> : vector<8x32xf32>
    %75 = tpu.matmul %73, %74, %cst_35 {dimension_numbers = #tpu.dot_dimension_numbers<[1], [0], [0], [1], [0, 0, 1, 1], [], []>} : vector<8x32xbf16>, vector<32x32xbf16>, vector<8x32xf32> -> vector<8x32xf32>
    %c0_36 = arith.constant 0 : index
    %c0_37 = arith.constant 0 : index
    %76 = vector.load %arg12[%c0_36, %c0_37] : memref<1x32xf32, #tpu.memory_space<vmem>>, vector<1x32xf32>
    %77 = vector.broadcast %76 : vector<1x32xf32> to vector<8x32xf32>
    %78 = arith.addf %75, %77 : vector<8x32xf32>
    %79 = arith.addf %3, %78 : vector<8x32xf32>
    %c0_38 = arith.constant 0 : index
    %c0_39 = arith.constant 0 : index
    %80 = vector.load %arg13[%c0_38, %c0_39] : memref<1x32xf32, #tpu.memory_space<vmem>>, vector<1x32xf32>
    %c0_40 = arith.constant 0 : index
    %c0_41 = arith.constant 0 : index
    %81 = vector.load %arg14[%c0_40, %c0_41] : memref<1x32xf32, #tpu.memory_space<vmem>>, vector<1x32xf32>
    %cst_42 = arith.constant dense<0.000000e+00> : vector<8xf32>
    %82 = vector.multi_reduction <add>, %79, %cst_42 [1] : vector<8x32xf32> to vector<8xf32>
    %83 = vector.shape_cast %82 : vector<8xf32> to vector<8x1xf32>
    %cst_43 = arith.constant 3.200000e+01 : f32
    %84 = vector.broadcast %cst_43 : f32 to vector<8x1xf32>
    %85 = arith.divf %83, %84 : vector<8x1xf32>
    %86 = vector.broadcast %85 : vector<8x1xf32> to vector<8x32xf32>
    %87 = arith.subf %79, %86 : vector<8x32xf32>
    %88 = arith.mulf %87, %87 : vector<8x32xf32>
    %cst_44 = arith.constant dense<0.000000e+00> : vector<8xf32>
    %89 = vector.multi_reduction <add>, %88, %cst_44 [1] : vector<8x32xf32> to vector<8xf32>
    %90 = vector.shape_cast %89 : vector<8xf32> to vector<8x1xf32>
    %cst_45 = arith.constant 3.200000e+01 : f32
    %91 = vector.broadcast %cst_45 : f32 to vector<8x1xf32>
    %92 = arith.divf %90, %91 : vector<8x1xf32>
    %93 = vector.broadcast %85 : vector<8x1xf32> to vector<8x32xf32>
    %94 = arith.subf %79, %93 : vector<8x32xf32>
    %cst_46 = arith.constant 9.99999974E-6 : f32
    %95 = vector.broadcast %cst_46 : f32 to vector<8x1xf32>
    %96 = arith.addf %92, %95 : vector<8x1xf32>
    %97 = math.rsqrt %96 : vector<8x1xf32>
    %98 = vector.broadcast %97 : vector<8x1xf32> to vector<8x32xf32>
    %99 = arith.mulf %94, %98 : vector<8x32xf32>
    %100 = vector.broadcast %80 : vector<1x32xf32> to vector<8x32xf32>
    %101 = arith.mulf %99, %100 : vector<8x32xf32>
    %102 = vector.broadcast %81 : vector<1x32xf32> to vector<8x32xf32>
    %103 = arith.addf %101, %102 : vector<8x32xf32>
    %104 = arith.truncf %103 : vector<8x32xf32> to vector<8x32xbf16>
    %c0_47 = arith.constant 0 : index
    %c0_48 = arith.constant 0 : index
    %105 = vector.load %arg15[%c0_47, %c0_48] : memref<32x128xbf16, #tpu.memory_space<vmem>>, vector<32x128xbf16>
    %cst_49 = arith.constant dense<0.000000e+00> : vector<8x128xf32>
    %106 = tpu.matmul %104, %105, %cst_49 {dimension_numbers = #tpu.dot_dimension_numbers<[1], [0], [0], [1], [0, 0, 1, 1], [], []>} : vector<8x32xbf16>, vector<32x128xbf16>, vector<8x128xf32> -> vector<8x128xf32>
    %c0_50 = arith.constant 0 : index
    %c0_51 = arith.constant 0 : index
    %107 = vector.load %arg16[%c0_50, %c0_51] : memref<1x128xf32, #tpu.memory_space<vmem>>, vector<1x128xf32>
    %108 = vector.broadcast %107 : vector<1x128xf32> to vector<8x128xf32>
    %109 = arith.addf %106, %108 : vector<8x128xf32>
    %cst_52 = arith.constant 5.000000e-01 : f32
    %110 = vector.broadcast %cst_52 : f32 to vector<8x128xf32>
    %111 = arith.mulf %110, %109 : vector<8x128xf32>
    %cst_53 = arith.constant 4.471500e-02 : f32
    %112 = vector.broadcast %cst_53 : f32 to vector<8x128xf32>
    %113 = arith.mulf %112, %109 : vector<8x128xf32>
    %114 = arith.mulf %113, %109 : vector<8x128xf32>
    %115 = arith.mulf %114, %109 : vector<8x128xf32>
    %116 = arith.addf %109, %115 : vector<8x128xf32>
    %cst_54 = arith.constant 0.797884583 : f32
    %117 = vector.broadcast %cst_54 : f32 to vector<8x128xf32>
    %118 = arith.mulf %117, %116 : vector<8x128xf32>
    %119 = math.tanh %118 : vector<8x128xf32>
    %cst_55 = arith.constant 1.000000e+00 : f32
    %120 = vector.broadcast %cst_55 : f32 to vector<8x128xf32>
    %121 = arith.addf %120, %119 : vector<8x128xf32>
    %122 = arith.mulf %111, %121 : vector<8x128xf32>
    %123 = arith.truncf %122 : vector<8x128xf32> to vector<8x128xbf16>
    %c0_56 = arith.constant 0 : index
    %c0_57 = arith.constant 0 : index
    %124 = vector.load %arg17[%c0_56, %c0_57] : memref<128x32xbf16, #tpu.memory_space<vmem>>, vector<128x32xbf16>
    %cst_58 = arith.constant dense<0.000000e+00> : vector<8x32xf32>
    %125 = tpu.matmul %123, %124, %cst_58 {dimension_numbers = #tpu.dot_dimension_numbers<[1], [0], [0], [1], [0, 0, 1, 1], [], []>} : vector<8x128xbf16>, vector<128x32xbf16>, vector<8x32xf32> -> vector<8x32xf32>
    %c0_59 = arith.constant 0 : index
    %c0_60 = arith.constant 0 : index
    %126 = vector.load %arg18[%c0_59, %c0_60] : memref<1x32xf32, #tpu.memory_space<vmem>>, vector<1x32xf32>
    %127 = vector.broadcast %126 : vector<1x32xf32> to vector<8x32xf32>
    %128 = arith.addf %125, %127 : vector<8x32xf32>
    %129 = arith.addf %79, %128 : vector<8x32xf32>
    %c0_61 = arith.constant 0 : index
    %c0_62 = arith.constant 0 : index
    %c0_63 = arith.constant 0 : index
    %130 = vector.load %arg19[%c0_61, %c0_62, %c0_63] : memref<1x8x32xf32, #tpu.memory_space<vmem>>, vector<1x8x32xf32>
    %131 = vector.shape_cast %130 : vector<1x8x32xf32> to vector<8x32xf32>
    %132 = vector.shape_cast %129 : vector<8x32xf32> to vector<1x8x32xf32>
    tpu.vector_store %arg19[%c0_61, %c0_62, %c0_63], %132 {strides = array<i32>} : memref<1x8x32xf32, #tpu.memory_space<vmem>>, vector<1x8x32xf32>,
    return
  }
  func.func @transform_0(%arg0: i32, %arg1: i32) -> (i32, i32, i32) {
    %c0_i32 = arith.constant 0 : i32
    %c0_i32_0 = arith.constant 0 : i32
    return %arg0, %arg1, %c0_i32 : i32, i32, i32
  }
  func.func @transform_1(%arg0: i32, %arg1: i32) -> (i32, i32) {
    %c0_i32 = arith.constant 0 : i32
    %c0_i32_0 = arith.constant 0 : i32
    %c0_i32_1 = arith.constant 0 : i32
    return %c0_i32, %c0_i32_0 : i32, i32
  }
  func.func @transform_2(%arg0: i32, %arg1: i32) -> (i32, i32) {
    %c0_i32 = arith.constant 0 : i32
    %c0_i32_0 = arith.constant 0 : i32
    %c0_i32_1 = arith.constant 0 : i32
    return %c0_i32, %c0_i32_0 : i32, i32
  }
  func.func @transform_3(%arg0: i32, %arg1: i32) -> (i32, i32) {
    %c0_i32 = arith.constant 0 : i32
    %c0_i32_0 = arith.constant 0 : i32
    %c0_i32_1 = arith.constant 0 : i32
    return %c0_i32, %c0_i32_0 : i32, i32
  }
  func.func @transform_4(%arg0: i32, %arg1: i32) -> (i32, i32) {
    %c0_i32 = arith.constant 0 : i32
    %c0_i32_0 = arith.constant 0 : i32
    %c0_i32_1 = arith.constant 0 : i32
    return %c0_i32, %c0_i32_0 : i32, i32
  }
  func.func @transform_5(%arg0: i32, %arg1: i32) -> (i32, i32) {
    %c0_i32 = arith.constant 0 : i32
    %c0_i32_0 = arith.constant 0 : i32
    %c0_i32_1 = arith.constant 0 : i32
    return %c0_i32, %c0_i32_0 : i32, i32
  }
  func.func @transform_6(%arg0: i32, %arg1: i32) -> (i32, i32) {
    %c0_i32 = arith.constant 0 : i32
    %c0_i32_0 = arith.constant 0 : i32
    %c0_i32_1 = arith.constant 0 : i32
    return %c0_i32, %c0_i32_0 : i32, i32
  }
  func.func @transform_7(%arg0: i32, %arg1: i32) -> (i32, i32) {
    %c0_i32 = arith.constant 0 : i32
    %c0_i32_0 = arith.constant 0 : i32
    %c0_i32_1 = arith.constant 0 : i32
    return %c0_i32, %c0_i32_0 : i32, i32
  }
  func.func @transform_8(%arg0: i32, %arg1: i32) -> (i32, i32) {
    %c0_i32 = arith.constant 0 : i32
    %c0_i32_0 = arith.constant 0 : i32
    %c0_i32_1 = arith.constant 0 : i32
    return %c0_i32, %c0_i32_0 : i32, i32
  }
  func.func @transform_9(%arg0: i32, %arg1: i32) -> (i32, i32) {
    %c0_i32 = arith.constant 0 : i32
    %c0_i32_0 = arith.constant 0 : i32
    %c0_i32_1 = arith.constant 0 : i32
    return %c0_i32, %c0_i32_0 : i32, i32
  }
  func.func @transform_10(%arg0: i32, %arg1: i32) -> (i32, i32) {
    %c0_i32 = arith.constant 0 : i32
    %c0_i32_0 = arith.constant 0 : i32
    %c0_i32_1 = arith.constant 0 : i32
    return %c0_i32, %c0_i32_0 : i32, i32
  }
  func.func @transform_11(%arg0: i32, %arg1: i32) -> (i32, i32) {
    %c0_i32 = arith.constant 0 : i32
    %c0_i32_0 = arith.constant 0 : i32
    %c0_i32_1 = arith.constant 0 : i32
    return %c0_i32, %c0_i32_0 : i32, i32
  }
  func.func @transform_12(%arg0: i32, %arg1: i32) -> (i32, i32) {
    %c0_i32 = arith.constant 0 : i32
    %c0_i32_0 = arith.constant 0 : i32
    %c0_i32_1 = arith.constant 0 : i32
    return %c0_i32, %c0_i32_0 : i32, i32
  }
  func.func @transform_13(%arg0: i32, %arg1: i32) -> (i32, i32) {
    %c0_i32 = arith.constant 0 : i32
    %c0_i32_0 = arith.constant 0 : i32
    %c0_i32_1 = arith.constant 0 : i32
    return %c0_i32, %c0_i32_0 : i32, i32
  }
  func.func @transform_14(%arg0: i32, %arg1: i32) -> (i32, i32) {
    %c0_i32 = arith.constant 0 : i32
    %c0_i32_0 = arith.constant 0 : i32
    %c0_i32_1 = arith.constant 0 : i32
    return %c0_i32, %c0_i32_0 : i32, i32
  }
  func.func @transform_15(%arg0: i32, %arg1: i32) -> (i32, i32) {
    %c0_i32 = arith.constant 0 : i32
    %c0_i32_0 = arith.constant 0 : i32
    %c0_i32_1 = arith.constant 0 : i32
    return %c0_i32, %c0_i32_0 : i32, i32
  }
  func.func @transform_16(%arg0: i32, %arg1: i32) -> (i32, i32) {
    %c0_i32 = arith.constant 0 : i32
    %c0_i32_0 = arith.constant 0 : i32
    %c0_i32_1 = arith.constant 0 : i32
    return %c0_i32, %c0_i32_0 : i32, i32
  }
  func.func @transform_17(%arg0: i32, %arg1: i32) -> (i32, i32, i32) {
    %c0_i32 = arith.constant 0 : i32
    %c0_i32_0 = arith.constant 0 : i32
    return %arg0, %arg1, %c0_i32 : i32, i32, i32
  }
}

</mosaic_0001>

<bundles_post_ra>
// kernel: tpu_custom_call.1
= control target key start
LH: loop header
LB: loop body
LE: loop exit
PB: predicated region body
PF: predicated region fallthrough
CT: control target
= control target key end

     0   :  { %s3921_s0 = inlined_call_operand.vmem [shape: f32[2,8,32], index: 0, kind: input, shape index: {}]   ;;  %s3922_s1 = inlined_call_operand.vmem [shape: f32[1,32], index: 1, kind: input, shape index: {}]   ;;  %s3923_s2 = inlined_call_operand.vmem [shape: f32[1,32], index: 2, kind: input, shape index: {}]   ;;  %s3924_s3 = inlined_call_operand.vmem [shape: bf16[32,32], index: 3, kind: input, shape index: {}]   ;;  %s3925_s4 = inlined_call_operand.hbm [shape: f32[1,32], index: 4, kind: input, shape index: {}]   ;;  %s3926_s5 = inlined_call_operand.vmem [shape: bf16[32,32], index: 5, kind: input, shape index: {}]   ;;  %s3927_s6 = inlined_call_operand.hbm [shape: f32[1,32], index: 6, kind: input, shape index: {}]   ;;  %s3928_s7 = inlined_call_operand.vmem [shape: bf16[32,32], index: 7, kind: input, shape index: {}]   ;;  %s3929_s8 = inlined_call_operand.hbm [shape: f32[1,32], index: 8, kind: input, shape index: {}]   ;;  %s3930_s9 = inlined_call_operand.vmem [shape: bf16[32,32], index: 9, kind: input, shape index: {}]   ;;  %s3931_s10 = inlined_call_operand.vmem [shape: f32[1,32], index: 10, kind: input, shape index: {}]   ;;  %s3932_s11 = inlined_call_operand.vmem [shape: f32[1,32], index: 11, kind: input, shape index: {}]   ;;  %s3933_s12 = inlined_call_operand.vmem [shape: f32[1,32], index: 12, kind: input, shape index: {}]   ;;  %s3934_s13 = inlined_call_operand.vmem [shape: bf16[32,128], index: 13, kind: input, shape index: {}]   ;;  %s3935_s14 = inlined_call_operand.vmem [shape: f32[1,128], index: 14, kind: input, shape index: {}]   ;;  %s3936_s15 = inlined_call_operand.vmem [shape: bf16[128,32], index: 15, kind: input, shape index: {}]   ;;  %s3937_s16 = inlined_call_operand.vmem [shape: f32[1,32], index: 16, kind: input, shape index: {}]   ;;  %s3938_s17 = inlined_call_operand.hbm [shape: f32[2,8,32], index: 17, kind: output, shape index: {}]  }
   0x1   :  { %3953 = sst [smem:[#allocation22_spill]] %s3921_s0 }
   0x2   :  { %3954 = sst [smem:[#allocation23_spill]] %s3922_s1 }
   0x3   :  { %3955 = sst [smem:[#allocation24_spill]] %s3927_s6 }
   0x4   :  { %3956 = sst [smem:[#allocation25_spill]] %s3937_s16 }
   0x5   :  { %3957 = sst [smem:[#allocation26_spill]] %s3938_s17 }
   0x6   :  { %22 = vsyncpa [#allocation5], 0 }
   0x7   :  { %23 = vsyncpa [#allocation8], 0 }
   0x8   :  { %24 = vsyncpa [#allocation6], 0 }
   0x9   :  { %26 = vsyncpa [#allocation6 + $0x1], 0  ;;  %s3254_s24 = smov 0   ;;  %s3256_s25 = smov 0  }
   0xa   :  { %s3258_s26 = smov 0   ;;  %s3260_s27 = smov 0  }
   0xb   :  { %s3262_s28 = smov 0   ;;  %s3264_s29 = smov 0  }
   0xc LB: > { %3958 = sst [smem:[#allocation14_spill]] %s3074_s24  ;;  %s2405_s0 = sadd.s32 4294967295, %s3094_s29   ;;  %s3094_s29 = sphi %s3264_s29, %s32_s29   ;;  %s3090_s28 = sphi %s3262_s28, %s4002_s28   ;;  %s3086_s27 = sphi %s3260_s27, %s4001_s27   ;;  %s3082_s26 = sphi %s3258_s26, %s4000_s26   ;;  %s3078_s25 = sphi %s3256_s25, %s4004_s25   ;;  %s3074_s24 = sphi %s3254_s24, %s4003_s24  }
   0xd   : > { %3959 = sst [smem:[#allocation15_spill]] %s3082_s26  ;;  %s2406_s30 = sadd.s32 4294967294, %s3094_s29  }
   0xe   : > { %3960 = sst [smem:[#allocation16_spill]] %s3090_s28  ;;  %s44_s18 = sadd.s32 1, %s3090_s28 }
   0xf   : > { %3961 = sst [smem:[#allocation17_spill]] %s3094_s29  ;;  %s417_s19 = sadd.s32 1, %s3082_s26 }
  0x10   : > { %p46_p0 = scmp.ge.s32.totalorder %s44_s18, 2  ;;  %p427_p1 = scmp.ne.s32.totalorder %s3082_s26, %s3078_s25 }
  0x11   : > { %p428_p2 = scmp.eq.s32.totalorder %s2405_s0, 1  ;;  %p433_p3 = scmp.ne.s32.totalorder %s3078_s25, %s3074_s24 }
  0x12   : > { %s4006_s18 = smov (%p46_p0, %s44_s18), 0  ;;  %p434_p5 = scmp.eq.s32.totalorder %s2406_s30, 1 }
  0x13   : > { %3962 = sst [smem:[#allocation18_spill]] %s4006_s18  ;;  %p3294_p4 = por %p428_p2, %p427_p1 }
  0x14   : > { %s412_s20 = ssub.s32 %s3090_s28, %s4006_s18  ;;  %p2407_p6 = scmp.ge.s32.totalorder %s3094_s29, 1 }
  0x15   : > { %s3963_s1 = scalar_select %p3294_p4, 1, 0 }
  0x16   : > { %p415_p7 = scmp.eq.s32.totalorder %s412_s20, 0  ;;  %p3301_p8 = por %p434_p5, %p433_p3 }
  0x17   : > { %3964 = sst [smem:[#allocation19_spill]] %s3963_s1  ;;  %p441_p9 = scmp.lt.s32.totalorder %s3094_s29, 3 }
  0x18   : > { %s3965_s21 = scalar_select %p3301_p8, 1, 0 }
  0x19   : > { %s3307_s22 = scalar_select %p415_p7, %s3082_s26, %s417_s19  }
  0x1a   : > { %3966 = sst [smem:[#allocation20_spill]] %s3965_s21  ;;  %p3309_p10 = pnand %p2407_p6, %p441_p9 }
  0x1b   : > { %3967 = sst [smem:[#allocation21_spill]] %s3307_s22  ;;  %p3313_p11 = scmp.eq.s32.totalorder %s2405_s0, 0 }
  0x1c   : > { %s3968_s23 = scalar_select %p3309_p10, 1, 0 }
  0x1d   : > { %s3969_s24 = scalar_select %p3313_p11, 1, 0 }
  0x1e   : > { %p2636_p12 = pneg %p3309_p10  ;;  %s3148_s30 = smov [#allocation7]  }
  0x1f   : > { %s477_s20 = sshll.u32 %s3148_s30, 4  ;;  %s3149_s19 = smov [#allocation4]   ;;  %s478_s20 = int_to_ptr.vmem [resolvable:$true] %s477_s20 }
  0x20   : > { %p3321_p13 = pnand %p3313_p11, %p2636_p12  ;;  %s463_s28 = sshll.u32 %s3149_s19, 4  ;;  %s3325_s28 = int_to_ptr.vmem [resolvable:$true] %s463_s28 }
  0x21   : > { %s3971_s6 = sld [smem:[#allocation24_spill]] }
  0x22   : > { %p3335_p1 = pneg %p3321_p13 }
  0x27   : > { %s2872_s26 = scalar_lea.hbm %s3971_s6, 16 }
  0x28   : > { %p2873_p0 = scmp.ne.s32.totalorder %s3971_s6, %s2872_s26  ;;  %p2879_p5 = scmp.lt.u32.totalorder %s2872_s26, %s3971_s6 }
  0x2a   : > { %p2875_p2 = pnand %p3335_p1, %p2873_p0 }
  0x2c   : > { %p2876_p3 = pneg %p2875_p2 }
  0x2e   : > { %p2881_p6 = pnand %p2879_p5, %p2876_p3 }
  0x30   : > { %2884 = shalt.err (!%p2881_p6)
}
  0x31   : > { %s2885_s22 = scalar_lea.vmem %s478_s20, 16  ;;  %s2892_s29 = scalar_lea.vmem %s478_s20, 32 }
  0x32   : > { %p2886_p7 = scmp.ne.s32.totalorder %s478_s20, %s2885_s22  ;;  %p2893_p8 = scmp.lt.s32.totalorder %s478_s20, %s478_s20 }
  0x33   : > { %p2894_p4 = scmp.lt.s32.totalorder %s2892_s29, %s2885_s22 }
  0x34   : > { %p2888_p9 = pnand %p2886_p7, %p3335_p1 }
  0x35   : > { %p2895_p11 = por %p2894_p4, %p2893_p8 }
  0x36   : > { %p2889_p12 = pneg %p2888_p9 }
  0x38   : > { %p2896_p10 = pnand %p2895_p11, %p2889_p12 }
  0x3a   : > { %2899 = shalt.err (!%p2896_p10)
}
  0x3b   : > { %2642 = dma.hbm_to_vmem [thread:$0]  (!%p3321_p13), %s3971_s6, 16, %s478_s20, [#allocation8]  }
  0x3c   : > { %s2900_s19 = scalar_lea.hbm %s3925_s4, 16 }
  0x3d   : > { %p2901_p0 = scmp.ne.s32.totalorder %s3925_s4, %s2900_s19  ;;  %p2907_p8 = scmp.lt.u32.totalorder %s2900_s19, %s3925_s4 }
  0x3f   : > { %p2903_p2 = pnand %p2901_p0, %p3335_p1 }
  0x41   : > { %p2904_p4 = pneg %p2903_p2 }
  0x43   : > { %p2909_p10 = pnand %p2907_p8, %p2904_p4 }
  0x45   : > { %2912 = shalt.err (!%p2909_p10)
}
  0x46   : > { %s2913_s20 = scalar_lea.vmem %s3325_s28, 16  ;;  %s2920_s16 = scalar_lea.vmem %s3325_s28, 32 }
  0x47   : > { %p2914_p11 = scmp.ne.s32.totalorder %s3325_s28, %s2913_s20  ;;  %p2921_p6 = scmp.lt.s32.totalorder %s3325_s28, %s3325_s28 }
  0x48   : > { %p2922_p7 = scmp.lt.s32.totalorder %s2920_s16, %s2913_s20 }
  0x49   : > { %p2916_p3 = pnand %p2914_p11, %p3335_p1 }
  0x4a   : > { %p2923_p9 = por %p2922_p7, %p2921_p6 }
  0x4b   : > { %p2917_p5 = pneg %p2916_p3 }
  0x4d   : > { %p2924_p12 = pnand %p2923_p9, %p2917_p5 }
  0x4f   : > { %2927 = shalt.err (!%p2924_p12)
}
  0x50   : > { %2639 = dma.hbm_to_vmem [thread:$0]  (!%p3321_p13), %s3925_s4, 16, %s3325_s28, [#allocation5]  }
  0x51   : > { %s3150_s0 = smov [#allocation9]   ;;  %s2928_s22 = scalar_lea.hbm %s3929_s8, 16 }
  0x52   : > { %s491_s17 = sshll.u32 %s3150_s0, 4  ;;  %p2929_p0 = scmp.ne.s32.totalorder %s3929_s8, %s2928_s22  ;;  %s492_s17 = int_to_ptr.vmem [resolvable:$true] %s491_s17 }
  0x53   : > { %p2935_p8 = scmp.lt.u32.totalorder %s2928_s22, %s3929_s8 }
  0x54   : > { %p2931_p2 = pnand %p2929_p0, %p3335_p1 }
  0x56   : > { %p2932_p4 = pneg %p2931_p2 }
  0x58   : > { %p2937_p10 = pnand %p2935_p8, %p2932_p4 }
  0x5a   : > { %2940 = shalt.err (!%p2937_p10)
}
  0x5b   : > { %s2941_s28 = scalar_lea.vmem %s492_s17, 16  ;;  %s2948_s1 = scalar_lea.vmem %s492_s17, 32 }
  0x5c   : > { %p2942_p11 = scmp.ne.s32.totalorder %s492_s17, %s2941_s28  ;;  %p2949_p6 = scmp.lt.s32.totalorder %s492_s17, %s492_s17 }
  0x5d   : > { %p2950_p7 = scmp.lt.s32.totalorder %s2948_s1, %s2941_s28 }
  0x5e   : > { %p2944_p3 = pnand %p2942_p11, %p3335_p1 }
  0x5f   : > { %p2951_p9 = por %p2950_p7, %p2949_p6 }
  0x60   : > { %p2945_p5 = pneg %p2944_p3 }
  0x62   : > { %p2952_p12 = pnand %p2951_p9, %p2945_p5 }
  0x64   : > { %2955 = shalt.err (!%p2952_p12)
}
  0x65   : > { %2645 = dma.hbm_to_vmem [thread:$0]  (!%p3321_p13), %s3929_s8, 16, %s492_s17, [#allocation8]  }
  0x66   : > { %p3973_p0 = scmp.ne.s32.totalorder %s3968_s23, 0 }
  0x67   : > { %p3974_p2 = scmp.ne.s32.totalorder (!%p3973_p0), %s3969_s24, 0 }
  0x68   : > { %538 = sbr.rel (%p3973_p0) target bundleno = 2574 (0xa0e), region = 88 }
  0x6f   : > { %3061 = dma.done.wait (%p3974_p2), [#allocation5], 16  }
  0x70   : > { %3063 = vsyncadd (%p3974_p2), [#allocation5], 4294967280 }
  0x71   : > { %3065 = dma.done.wait (%p3974_p2), [#allocation8], 32  }
  0x72   : > { %3067 = vsyncadd (%p3974_p2), [#allocation8], 4294967264  ;;  %p600_p1 = scmp.lt.s32.totalorder %s3086_s27, 1  ;;  %s3975_s17 = sld [smem:[#allocation22_spill]]  ;;  %vm612_vm0 = vcmask 261120   ;;  %v2824_v7 = vld [vmem:[%s3926_s5] sm:$0xff]   ;;  %v786_v24 = vlaneseq }
  0x73   : > { %s597_s24 = sand.u32 1, %s3078_s25   ;;  %v2825_v8 = vld [vmem:[%s3928_s7] sm:$0xff]   ;;  %v3151_v9 = vmov 0.0   ;;  %v2826_v10 = vld [vmem:[%s3926_s5 + $0x8] sm:$0xff]   ;;  %vm3152_vm1 = vmmov 0   ;;  %s3976_s23 = sld [smem:[#allocation23_spill]] }
  0x74   : > { %s601_s6 = scalar_select %p600_p1, %s3086_s27, 1  ;;  %2514 = vmatprep.subr.bf16.mxu0 %v3151_v9  ;;  %2522 = vmatprep.subr.bf16.mxu1 %v3151_v9  ;;  %v2827_v11 = vld [vmem:[%s3928_s7 + $0x8] sm:$0xff]   ;;  %v2419_v18 = vld [vmem:[%s3923_s2] ss:$0 sm:$0xff]  ;;  %v3458_v25 = vand.u32 127, %v786_v24  ;;  %v3470_v49 = vshrl.u32 %v786_v24, 7 }
  0x75   : > { %s3423_s16 = sshll.u32 %s597_s24, 3  ;;  %2515 = vmatpush3.bf16.msra.mxu0 %v2824_v7  ;;  %2523 = vmatpush3.bf16.msra.mxu1 %v2825_v8  ;;  %v2828_v21 = vld [vmem:[%s3924_s3] sm:$0xff]   ;;  %v2829_v23 = vld [vmem:[%s3924_s3 + $0x8] sm:$0xff]   ;;  %s3153_s20 = smov 104   ;;  %v3156_v44 = vmov 1983009808  }
  0x76   : > { %s2417_s18 = sshll.u32 %s601_s6, 3  ;;  %2516 = vmatprep.subr.bf16.mxu0 %v3151_v9  ;;  %2524 = vmatprep.subr.bf16.mxu1 %v3151_v9  ;;  %v2420_v26 = vld [vmem:[#allocation7] ss:$0 sm:$0xff]  ;;  %s3154_s28 = smov 120   ;;  %v2424_v36 = vld [vmem:[#allocation9] ss:$0 sm:$0xff]  ;;  %v784_v45 = vunpack.c.l.s4 %v3156_v44 }
  0x77   : > { %2518 = vmatprep.mubr.msk.bf16.mxu0 %vm3152_vm1, %v3151_v9  ;;  %2526 = vmatprep.mubr.msk.bf16.mxu1 %vm3152_vm1, %v3151_v9  ;;  %s3155_s1 = smov 112   ;;  %v2432_v42 = vld [vmem:[#allocation4] ss:$0 sm:$0xff]  ;;  %v3157_v46 = vmov 1934713408   ;;  %vm925_vm2 = vcmask 60416  }
  0x78   : > { %s606_s26 = scalar_lea.vmem %s3975_s17, %s2417_s18  ;;  %v816_v47 = vunpack.c.l.s4 %v3157_v46  ;;  %v785_v48 = vunpack.c.0.s8 %v784_v45  ;;  %s599_s21 = scalar_lea.vmem [#allocation10], %s3423_s16 }
  0x79   : > { %v3408_v0 = vld [vmem:[%s606_s26] sm:$0xff]  ;;  %2517 = vmatpush3.bf16.msra.mxu0 %v2826_v10  ;;  %2525 = vmatpush3.bf16.msra.mxu1 %v2827_v11  ;;  %s3579_s0 = smov 0  }
  0x7a   : > { %v613_v1 = vsel %vm612_vm0, %v3408_v0, 0.0  ;;  %2530 = vmatprep.subr.bf16.mxu0 %v3151_v9  ;;  %v2418_v16 = vld [vmem:[%s3976_s23] ss:$0 sm:$0xff]  ;;  %v817_v52 = vunpack.c.0.s8 %v816_v47  ;;  %v3473_v53 = vsub.s32 %v785_v48, %v3470_v49 }
  0x7b   : > { %614 = vadd.xlane.f32.xlu0 %v613_v1 }
  0x7c   : > { %v3476_v59 = vsub.s32 %v817_v52, %v3470_v49 }
 0x108   : > { %v615_v2 = vpop.xlane.xlu0 %614 }
 0x109   : > { %v617_v3 = vmul.f32 0.03125, %v615_v2 }
 0x10b   : > { %v618_v4 = vsub.f32 %v3408_v0, %v617_v3 }
 0x10d   : > { %v619_v5 = vmul.f32 %v618_v4, %v618_v4 }
 0x10f   : > { %v620_v6 = vsel %vm612_vm0, %v619_v5, 0.0 }
 0x110   : > { %621 = vadd.xlane.f32.xlu0 %v620_v6 }
 0x19d   : > { %v622_v12 = vpop.xlane.xlu0 %621 }
 0x19e   : > { %v623_v13 = vmul.f32 0.03125, %v622_v12 }
 0x1a0   : > { %v624_v14 = vadd.f32 1e-05, %v623_v13 }
 0x1a2   : > { %2830 = vrsqrt.f32 %v624_v14 }
 0x1ac   : > { %v2831_v15 = vpop.eup %2830 }
 0x1ad   : > { %v626_v17 = vmul.f32 %v2831_v15, %v618_v4 }
 0x1af   : > { %v633_v19 = vmul.f32 %v2418_v16, %v626_v17 }
 0x1b1   : > { %v640_v20 = vadd.f32 %v2419_v18, %v633_v19 }
 0x1b3   : > { %v641_v22 = vpack.c.bf16 %v640_v20, %v640_v20 }
 0x1b5   : > { %2519 = vmatmul.mubr.msk.bf16.vlgmr.msra.gmra.mrb[0].mxu0 %vm612_vm0, %v641_v22  ;;  %2527 = vmatmul.mubr.msk.bf16.vlgmr.msra.gmra.mrb[0].mxu1 %vm612_vm0, %v641_v22 }
 0x1b6   : > { %2531 = vmatpush3.bf16.msra.mxu0 %v2828_v21  ;;  %2534 = vmatprep.mubr.msk.bf16.mxu0 %vm3152_vm1, %v3151_v9 }
 0x1b7   : > { %2532 = vmatprep.subr.bf16.mxu0 %v3151_v9 }
 0x1ba   : > { %2533 = vmatpush3.bf16.msra.mxu0 %v2829_v23 }
 0x1bd   : > { %2535 = vmatmul.mubr.msk.bf16.vlgmr.msra.gmra.mrb[4].mxu0 %vm612_vm0, %v641_v22 }
 0x288   : > { %v702_v27 = vpop.f32.mrb[0].mxu0  ;;  %v765_v28 = vpop.f32.mrb[0].mxu1 }
 0x289   : > { %v703_v29 = vadd.f32 %v2420_v26, %v702_v27  ;;  %v2520_v30 = vpop.f32.mrb[1].mxu0  ;;  %v2528_v31 = vpop.f32.mrb[1].mxu1  ;;  %v3460_v38 = vadd.f32 %v2424_v36, %v765_v28 }
 0x28a   : > { %v705_v32 = vpop.f32.mrb[2].mxu0  ;;  %v768_v33 = vpop.f32.mrb[2].mxu1 }
 0x28b   : > { %v2529_v34 = vpop.f32.mrb[3].mxu1  ;;  %778 = vrot.lane.b32.xlu0 %v703_v29, %s3153_s20  ;;  %772 = vrot.lane.b32.xlu1 %v703_v29, %s3154_s28  ;;  %v2521_v35 = vpop.f32.mrb[3].mxu0 }
 0x28f   : > { %775 = vrot.lane.b32.xlu1 %v703_v29, %s3155_s1 }
 0x290   : > { %v1143_v37 = vpop.f32.mrb[4].mxu0 }
 0x291   : > { %v2536_v39 = vpop.f32.mrb[5].mxu0  ;;  %v3465_v43 = vadd.f32 %v2432_v42, %v1143_v37 }
 0x292   : > { %v1146_v40 = vpop.f32.mrb[6].mxu0 }
 0x293   : > { %931 = vrot.lane.b32.xlu1 %v3460_v38, %s3154_s28  ;;  %v2537_v41 = vpop.f32.mrb[7].mxu0 }
 0x297   : > { %934 = vrot.lane.b32.xlu1 %v3460_v38, %s3155_s1 }
 0x29b   : > { %937 = vrot.lane.b32.xlu1 %v3460_v38, %s3153_s20 }
 0x29f   : > { %1150 = vrot.lane.b32.xlu1 %v3465_v43, %s3154_s28 }
 0x2a3   : > { %1153 = vrot.lane.b32.xlu1 %v3465_v43, %s3155_s1 }
 0x2a7   : > { %1156 = vrot.lane.b32.xlu1 %v3465_v43, %s3153_s20 }
 0x2fd   : > { %v779_v50 = vpop.permute.xlu0 %778  ;;  %v773_v51 = vpop.permute.xlu1 %772 }
 0x2fe   : > { %v797_v54 = vcombine.low %v773_v51, %v779_v50  ;;  %v798_v55 = vcombine.high %v773_v51, %v779_v50 }
 0x300   : > { %v805_v60 = vrot.slane %v797_v54, %v3473_v53  ;;  %v812_v61 = vrot.slane %v798_v55, %v3473_v53 }
 0x301   : > { %v776_v56 = vpop.permute.xlu1 %775 }
 0x302   : > { %v781_v57 = vcombine.low %v703_v29, %v776_v56  ;;  %v782_v58 = vcombine.high %v703_v29, %v776_v56 }
 0x304   : > { %v789_v62 = vrot.slane %v781_v57, %v3473_v53  ;;  %v796_v63 = vrot.slane %v782_v58, %v3473_v53 }
 0x305   : > { %v932_v1 = vpop.permute.xlu1 %931 }
 0x306   : > { %v813_v2 = vcombine.low %v789_v62, %v805_v60  ;;  %v814_v3 = vcombine.high %v789_v62, %v805_v60  ;;  %v829_v4 = vcombine.low %v796_v63, %v812_v61  ;;  %v830_v5 = vcombine.high %v796_v63, %v812_v61 }
 0x308   : > { %v821_v6 = vrot.slane %v813_v2, %v3476_v59  ;;  %v828_v7 = vrot.slane %v814_v3, %v3476_v59  ;;  %v837_v8 = vrot.slane %v829_v4, %v3476_v59  ;;  %v844_v10 = vrot.slane %v830_v5, %v3476_v59 }
 0x309   : > { %v935_v11 = vpop.permute.xlu1 %934 }
 0x30a   : > { %v849_v12 = vcombine.low %v821_v6, %v828_v7  ;;  %v2428_v13 = vcombine.high %v821_v6, %v828_v7  ;;  %v865_v14 = vcombine.low %v837_v8, %v844_v10  ;;  %v2429_v15 = vcombine.high %v837_v8, %v844_v10 }
 0x30b   : > { %v940_v20 = vcombine.low %v3460_v38, %v935_v11  ;;  %v941_v21 = vcombine.high %v3460_v38, %v935_v11 }
 0x30c   : > { %v856_v16 = vrot.slane %v849_v12, %v3473_v53  ;;  %v864_v17 = vrot.slane %v2428_v13, %v3473_v53  ;;  %v872_v18 = vrot.slane %v865_v14, %v3473_v53  ;;  %v880_v19 = vrot.slane %v2429_v15, %v3473_v53 }
 0x30d   : > { %v938_v22 = vpop.permute.xlu1 %937  ;;  %v948_v34 = vrot.slane %v940_v20, %v3473_v53  ;;  %v955_v35 = vrot.slane %v941_v21, %v3473_v53 }
 0x30e   : > { %v881_v23 = vcombine.low %v856_v16, %v864_v17  ;;  %v882_v24 = vcombine.high %v856_v16, %v864_v17  ;;  %v897_v26 = vcombine.low %v872_v18, %v880_v19  ;;  %v898_v27 = vcombine.high %v872_v18, %v880_v19 }
 0x30f   : > { %v956_v28 = vcombine.low %v932_v1, %v938_v22  ;;  %v957_v29 = vcombine.high %v932_v1, %v938_v22 }
 0x310   : > { %v889_v30 = vrot.slane %v881_v23, %v3476_v59  ;;  %v896_v31 = vrot.slane %v882_v24, %v3476_v59  ;;  %v905_v32 = vrot.slane %v897_v26, %v3476_v59  ;;  %v912_v33 = vrot.slane %v898_v27, %v3476_v59 }
 0x311   : > { %v964_v36 = vrot.slane %v956_v28, %v3473_v53  ;;  %v971_v37 = vrot.slane %v957_v29, %v3473_v53  ;;  %v1151_v38 = vpop.permute.xlu1 %1150 }
 0x312   : > { %v913_v39 = vcombine.low %v889_v30, %v905_v32  ;;  %v914_v40 = vcombine.high %v889_v30, %v905_v32  ;;  %v915_v41 = vcombine.low %v896_v31, %v912_v33  ;;  %v916_v42 = vcombine.high %v896_v31, %v912_v33 }
 0x313   : > { %v972_v44 = vcombine.low %v948_v34, %v964_v36  ;;  %v973_v45 = vcombine.high %v948_v34, %v964_v36  ;;  %v988_v46 = vcombine.low %v955_v35, %v971_v37  ;;  %v989_v47 = vcombine.high %v955_v35, %v971_v37 }
 0x314   : > { %v917_v48 = vpack.c.bf16 %v913_v39, %v913_v39  ;;  %v918_v50 = vpack.c.bf16 %v914_v40, %v914_v40  ;;  %v919_v51 = vpack.c.bf16 %v915_v41, %v915_v41  ;;  %v920_v52 = vpack.c.bf16 %v916_v42, %v916_v42 }
 0x315   : > { %v980_v54 = vrot.slane %v972_v44, %v3476_v59  ;;  %v987_v55 = vrot.slane %v973_v45, %v3476_v59  ;;  %v996_v56 = vrot.slane %v988_v46, %v3476_v59  ;;  %v1003_v57 = vrot.slane %v989_v47, %v3476_v59  ;;  %v1154_v58 = vpop.permute.xlu1 %1153 }
 0x316   : > { %926 = vst.msk [vmem:[#allocation2] sm:$0xf] %vm925_vm2, %v917_v48  ;;  %927 = vst.msk [vmem:[#allocation2 + $0x4] sm:$0xf] %vm925_vm2, %v918_v50  ;;  %v1159_v1 = vcombine.low %v3465_v43, %v1154_v58  ;;  %v1160_v2 = vcombine.high %v3465_v43, %v1154_v58 }
 0x317   : > { %928 = vst.msk [vmem:[#allocation2 + $0x8] sm:$0xf] %vm925_vm2, %v919_v51  ;;  %929 = vst.msk [vmem:[#allocation2 + $0xc] sm:$0xf] %vm925_vm2, %v920_v52  ;;  %v1008_v60 = vcombine.low %v980_v54, %v987_v55  ;;  %v2430_v61 = vcombine.high %v980_v54, %v987_v55  ;;  %v1024_v62 = vcombine.low %v996_v56, %v1003_v57 }
 0x318   : > { %v2431_v63 = vcombine.high %v996_v56, %v1003_v57  ;;  %v1167_v15 = vrot.slane %v1159_v1, %v3473_v53  ;;  %v1174_v16 = vrot.slane %v1160_v2, %v3473_v53 }
 0x319   : > { %v1015_v3 = vrot.slane %v1008_v60, %v3473_v53  ;;  %v1023_v4 = vrot.slane %v2430_v61, %v3473_v53  ;;  %v1031_v5 = vrot.slane %v1024_v62, %v3473_v53  ;;  %v1157_v7 = vpop.permute.xlu1 %1156 }
 0x31a   : > { %v1039_v6 = vrot.slane %v2431_v63, %v3473_v53  ;;  %v1175_v8 = vcombine.low %v1151_v38, %v1157_v7  ;;  %v1176_v10 = vcombine.high %v1151_v38, %v1157_v7  ;;  %v3561_v7 = vmov 0.0  }
 0x31b   : > { %v1040_v11 = vcombine.low %v1015_v3, %v1023_v4  ;;  %v1041_v12 = vcombine.high %v1015_v3, %v1023_v4  ;;  %v3555_v4 = vmov 0.0  }
 0x31c   : > { %v1056_v13 = vcombine.low %v1031_v5, %v1039_v6  ;;  %v1057_v14 = vcombine.high %v1031_v5, %v1039_v6  ;;  %v1183_v43 = vrot.slane %v1175_v8, %v3473_v53  ;;  %v1190_v17 = vrot.slane %v1176_v10, %v3473_v53 }
 0x31d   : > { %v1048_v18 = vrot.slane %v1040_v11, %v3476_v59  ;;  %v1055_v19 = vrot.slane %v1041_v12, %v3476_v59  ;;  %v3557_v5 = vmov 0.0   ;;  %v3559_v6 = vmov 0.0  }
 0x31e   : > { %v1064_v20 = vrot.slane %v1056_v13, %v3476_v59  ;;  %v1071_v21 = vrot.slane %v1057_v14, %v3476_v59  ;;  %v1191_v22 = vcombine.low %v1167_v15, %v1183_v43  ;;  %v1192_v23 = vcombine.high %v1167_v15, %v1183_v43 }
 0x31f   : > { %v1207_v24 = vcombine.low %v1174_v16, %v1190_v17  ;;  %v1208_v26 = vcombine.high %v1174_v16, %v1190_v17  ;;  %v3563_v8 = vmov 0.0   ;;  %v3565_v10 = vmov 0.0  }
 0x320   : > { %v1072_v27 = vcombine.low %v1048_v18, %v1064_v20  ;;  %v1073_v28 = vcombine.high %v1048_v18, %v1064_v20  ;;  %v1074_v29 = vcombine.low %v1055_v19, %v1071_v21  ;;  %v1075_v30 = vcombine.high %v1055_v19, %v1071_v21 }
 0x321   : > { %v1199_v31 = vrot.slane %v1191_v22, %v3476_v59  ;;  %v1206_v32 = vrot.slane %v1192_v23, %v3476_v59  ;;  %v1215_v33 = vrot.slane %v1207_v24, %v3476_v59  ;;  %v1222_v34 = vrot.slane %v1208_v26, %v3476_v59 }
 0x322   : > { %v1076_v35 = vpack.c.bf16 %v1072_v27, %v1072_v27  ;;  %v1077_v36 = vpack.c.bf16 %v1073_v28, %v1073_v28  ;;  %v1078_v37 = vpack.c.bf16 %v1074_v29, %v1074_v29  ;;  %v1079_v38 = vpack.c.bf16 %v1075_v30, %v1075_v30 }
 0x323   : > { %v1227_v39 = vcombine.low %v1199_v31, %v1206_v32  ;;  %v2436_v40 = vcombine.high %v1199_v31, %v1206_v32  ;;  %v1243_v41 = vcombine.low %v1215_v33, %v1222_v34  ;;  %v2437_v42 = vcombine.high %v1215_v33, %v1222_v34 }
 0x324   : > { %1082 = vst.msk [vmem:[#allocation3] sm:$0xf] %vm925_vm2, %v1076_v35  ;;  %1083 = vst.msk [vmem:[#allocation3 + $0x4] sm:$0xf] %vm925_vm2, %v1077_v36  ;;  %v3567_v11 = vmov 0.0   ;;  %v3569_v12 = vmov 0.0  }
 0x325   : > { %1084 = vst.msk [vmem:[#allocation3 + $0x8] sm:$0xf] %vm925_vm2, %v1078_v37  ;;  %1085 = vst.msk [vmem:[#allocation3 + $0xc] sm:$0xf] %vm925_vm2, %v1079_v38  ;;  %v1234_v44 = vrot.slane %v1227_v39, %v3473_v53  ;;  %v1242_v45 = vrot.slane %v2436_v40, %v3473_v53  ;;  %v1250_v46 = vrot.slane %v1243_v41, %v3473_v53  ;;  %v3571_v13 = vmov -1e+30  }
 0x326   : > { %v1258_v47 = vrot.slane %v2437_v42, %v3473_v53  ;;  %v3573_v14 = vmov -1e+30   ;;  %v3575_v15 = vmov -1e+30   ;;  %v3577_v16 = vmov -1e+30  }
 0x327   : > { %v1259_v48 = vcombine.low %v1234_v44, %v1242_v45  ;;  %v1260_v50 = vcombine.high %v1234_v44, %v1242_v45 }
 0x328   : > { %v1275_v51 = vcombine.low %v1250_v46, %v1258_v47  ;;  %v1276_v52 = vcombine.high %v1250_v46, %v1258_v47 }
 0x329   : > { %v1267_v54 = vrot.slane %v1259_v48, %v3476_v59  ;;  %v1274_v55 = vrot.slane %v1260_v50, %v3476_v59 }
 0x32a   : > { %v1283_v56 = vrot.slane %v1275_v51, %v3476_v59  ;;  %v1290_v57 = vrot.slane %v1276_v52, %v3476_v59 }
 0x32c   : > { %v3538_v58 = vcombine.low %v1267_v54, %v1283_v56  ;;  %v3540_v60 = vcombine.high %v1267_v54, %v1283_v56  ;;  %v3542_v61 = vcombine.low %v1274_v55, %v1290_v57  ;;  %v3544_v62 = vcombine.high %v1274_v55, %v1290_v57 }
 0x32e   : > { %v1295_v63 = vpack.c.bf16 %v3538_v58, %v3538_v58  ;;  %v1296_v1 = vpack.c.bf16 %v3540_v60, %v3540_v60  ;;  %v1297_v2 = vpack.c.bf16 %v3542_v61, %v3542_v61  ;;  %v1298_v3 = vpack.c.bf16 %v3544_v62, %v3544_v62 }
 0x32f LB: >> { %v3158_v43 = vmov 0.0   ;;  %s2438_s6 = sshll.u32 %s3146_s0, 3  ;;  %vm3159_vm3 = vmmov 0   ;;  %vm1339_vm4 = vcmask 64512   ;;  %vm1604_vm6 = vcmask 1043456   ;;  %s1309_s0 = sadd.s32 1, %s3146_s0   ;;  %s3146_s0 = sphi %s3579_s0, %s1309_s0   ;;  %v3142_v16 = vphi %v3577_v16, %v3989_v16   ;;  %v3138_v15 = vphi %v3575_v15, %v3988_v15   ;;  %v3134_v14 = vphi %v3573_v14, %v3987_v14   ;;  %v3130_v13 = vphi %v3571_v13, %v3986_v13   ;;  %v3126_v12 = vphi %v3569_v12, %v3985_v12   ;;  %v3122_v11 = vphi %v3567_v11, %v3984_v11   ;;  %v3118_v10 = vphi %v3565_v10, %v3983_v10   ;;  %v3114_v8 = vphi %v3563_v8, %v3982_v8   ;;  %v3110_v7 = vphi %v3561_v7, %v3981_v7   ;;  %v3106_v6 = vphi %v3559_v6, %v3980_v6   ;;  %v3102_v5 = vphi %v3557_v5, %v3979_v5   ;;  %v3098_v4 = vphi %v3555_v4, %v3978_v4  }
 0x330   : >> { %2538 = vmatprep.subr.bf16.mxu0 %v3158_v43  ;;  %2544 = vmatprep.subr.bf16.mxu1 %v3158_v43  ;;  %s3629_s18 = sshra.s32 %s2438_s6, 3  ;;  %v1524_v26 = vstv %s2438_s6  ;;  %p3731_p13 = scmp.ge.s32.totalorder %s1309_s0, 1 }
 0x331   : >> { %2540 = vmatprep.mubr.msk.bf16.mxu0 %vm3159_vm3, %v3158_v43  ;;  %2546 = vmatprep.mubr.msk.bf16.mxu1 %vm3159_vm3, %v3158_v43  ;;  %s2439_s23 = sshll.u32 %s3629_s18, 2  ;;  %v1525_v27 = vadd.s32 %v1524_v26, %v3458_v25  ;;  %s3160_s28 = smov (%p3731_p13), 8   ;;  %vm1948_vm7 = vcmask (%p3731_p13), 130048   ;;  %vm1950_vm8 = vcmask (%p3731_p13), 195584  }
 0x332   : >> { %s1328_s30 = scalar_lea.vmem [#allocation2], %s2439_s23  ;;  %s1334_s17 = scalar_lea.vmem [#allocation3], %s2439_s23 }
 0x333   : >> { %v1329_v17 = vld [vmem:[%s1328_s30] sm:$0xf]  ;;  %v1330_v18 = vld [vmem:[%s1328_s30 + $0x4] sm:$0xf]  ;;  %v1331_v21 = vld [vmem:[%s1328_s30 + $0x8] sm:$0xf]  ;;  %vm1526_vm5 = vcmp.ge.s32.totalorder %v3470_v49, %v1525_v27 }
 0x334   : >> { %v1344_v19 = vsel %vm1339_vm4, %v1329_v17, 0  ;;  %v1390_v20 = vsel %vm1339_vm4, %v1330_v18, 0  ;;  %v1332_v22 = vld [vmem:[%s1328_s30 + $0xc] sm:$0xf]  ;;  %v1436_v23 = vsel %vm1339_vm4, %v1331_v21, 0  ;;  %s3161_s1 = smov (%p3731_p13), 24  }
 0x335   : >> { %2539 = vmatpush3.bf16.xpose.msra.mxu0 %v1344_v19  ;;  %2545 = vmatpush3.bf16.xpose.msra.mxu1 %v1390_v20  ;;  %v1482_v24 = vsel %vm1339_vm4, %v1332_v22, 0  ;;  %v1335_v55 = vld [vmem:[%s1334_s17] sm:$0xf]  ;;  %v1336_v57 = vld [vmem:[%s1334_s17 + $0x4] sm:$0xf]  ;;  %s3162_s0 = smov (%p3731_p13), 16  }
 0x336   : >> { %2550 = vmatprep.subr.bf16.mxu0 %v3158_v43  ;;  %2556 = vmatprep.subr.bf16.mxu1 %v3158_v43  ;;  %v1606_v56 = vsel %vm1604_vm6, %v1335_v55, 0  ;;  %v1652_v17 = vsel %vm1604_vm6, %v1336_v57, 0  ;;  %v1337_v18 = vld [vmem:[%s1334_s17 + $0x8] sm:$0xf]  ;;  %v1338_v20 = vld [vmem:[%s1334_s17 + $0xc] sm:$0xf] }
 0x337   : >> { %v1698_v19 = vsel %vm1604_vm6, %v1337_v18, 0  ;;  %v1744_v21 = vsel %vm1604_vm6, %v1338_v20, 0  ;;  %s3990_s17 = sld [smem:[#allocation25_spill]] (%p3731_p13)  ;;  %s2471_s19 = sshll.u32 (%p3731_p13), %s3086_s27, 7 }
 0x338   : > { %s3991_s26 = sld [smem:[#allocation19_spill]] (%p3731_p13)  ;;  %s2254_s22 = sshll.u32 (%p3731_p13), %s599_s21, 4  ;;  %s3871_s22 = int_to_ptr.vmem [resolvable:$true] %s2254_s22 }
 0x339   : > { %s2240_s27 = scalar_lea.sflag (%p3731_p13), [#allocation6], %s597_s24  ;;  %s2956_s6 = scalar_lea.vmem (%p3731_p13), %s3871_s22, 128 }
 0x33a   : > { %p2957_p4 = scmp.ne.s32.totalorder (%p3731_p13), %s3871_s22, %s2956_s6  ;;  %s3163_s18 = smov (%p3731_p13), [#allocation10]  }
 0x33b   : > { %s2960_s23 = sshll.u32 (%p3731_p13), %s3163_s18, 4  ;;  %s2961_s23 = int_to_ptr.vmem [resolvable:$false] %s2960_s23 }
 0x33c   : >> { %2541 = vmatmul.mubr.msk.bf16.vlgmr.msra.gmra.mrb[0].mxu0 %vm1339_vm4, %v1295_v63  ;;  %2547 = vmatmul.mubr.msk.bf16.vlgmr.msra.gmra.mrb[0].mxu1 %vm1339_vm4, %v1296_v1  ;;  %s2962_s30 = scalar_lea.vmem (%p3731_p13), %s2961_s23, 256  ;;  %p2963_p3 = scmp.lt.s32.totalorder (%p3731_p13), %s3871_s22, %s2961_s23 }
 0x33d   : >> { %2551 = vmatpush3.bf16.xpose.msra.mxu0 %v1436_v23  ;;  %2557 = vmatpush3.bf16.xpose.msra.mxu1 %v1482_v24  ;;  %p2964_p5 = scmp.lt.s32.totalorder (%p3731_p13), %s2962_s30, %s2956_s6 }
 0x33e   : >> { %2552 = vmatprep.mubr.msk.bf16.mxu0 %vm3159_vm3, %v3158_v43  ;;  %2558 = vmatprep.mubr.msk.bf16.mxu1 %vm3159_vm3, %v3158_v43  ;;  %p3994_p8 = scmp.ne.s32.totalorder (%p3731_p13), %s3991_s26, 0 }
 0x33f   : >> { %2562 = vmatprep.subr.bf16.mxu0 %v3158_v43  ;;  %2568 = vmatprep.subr.bf16.mxu1 %v3158_v43  ;;  %p2965_p6 = por (%p3731_p13), %p2964_p5, %p2963_p3 }
 0x340   : > { %p2958_p10 = pnand (%p3731_p13), %p2957_p4, %p3994_p8 }
 0x342   : > { %p2959_p11 = pneg (%p3731_p13), %p2958_p10 }
 0x344   : >> { %2553 = vmatmul.mubr.msk.bf16.vlgmr.msra.gmra.mrb[4].mxu0 %vm1339_vm4, %v1297_v2  ;;  %2559 = vmatmul.mubr.msk.bf16.vlgmr.msra.gmra.mrb[4].mxu1 %vm1339_vm4, %v1298_v3  ;;  %p2966_p7 = pnand (%p3731_p13), %p2965_p6, %p2959_p11 }
 0x345   : >> { %2564 = vmatprep.mubr.msk.bf16.mxu0 %vm3159_vm3, %v3158_v43  ;;  %2570 = vmatprep.mubr.msk.bf16.mxu1 %vm3159_vm3, %v3158_v43 }
 0x346   : >> { %2563 = vmatpush3.bf16.msra.mxu0 %v1606_v56  ;;  %2569 = vmatpush3.bf16.msra.mxu1 %v1652_v17 }
 0x347   : >> { %2574 = vmatprep.subr.bf16.mxu0 %v3158_v43  ;;  %2580 = vmatprep.subr.bf16.mxu1 %v3158_v43 }
 0x40f   : >> { %v1380_v28 = vpop.f32.mrb[0].mxu0  ;;  %v1426_v29 = vpop.f32.mrb[0].mxu1 }
 0x410   : >> { %v1529_v30 = vsel %vm1526_vm5, %v1380_v28, -1e+30  ;;  %v2542_v31 = vpop.f32.mrb[1].mxu0  ;;  %v1530_v32 = vsel %vm1526_vm5, %v1426_v29, -1e+30  ;;  %v2548_v33 = vpop.f32.mrb[1].mxu1 }
 0x411   : >> { %v1383_v34 = vpop.f32.mrb[2].mxu0  ;;  %v1533_v35 = vsel %vm1339_vm4, %v1529_v30, -inf  ;;  %v1429_v36 = vpop.f32.mrb[2].mxu1  ;;  %v1536_v39 = vsel %vm1339_vm4, %v1530_v32, -inf }
 0x412   : >> { %1534 = vmax.xlane.f32.xlu0 %v1533_v35  ;;  %v2543_v37 = vpop.f32.mrb[3].mxu0  ;;  %v2549_v38 = vpop.f32.mrb[3].mxu1 }
 0x416   : >> { %1537 = vmax.xlane.f32.xlu0 %v1536_v39 }
 0x417   : >> { %v1472_v40 = vpop.f32.mrb[4].mxu0  ;;  %v1518_v41 = vpop.f32.mrb[4].mxu1 }
 0x418   : >> { %v1531_v42 = vsel %vm1526_vm5, %v1472_v40, -1e+30  ;;  %v2554_v44 = vpop.f32.mrb[5].mxu0  ;;  %v1532_v45 = vsel %vm1526_vm5, %v1518_v41, -1e+30  ;;  %v2560_v46 = vpop.f32.mrb[5].mxu1 }
 0x419   : >> { %v1475_v47 = vpop.f32.mrb[6].mxu0  ;;  %v1539_v48 = vsel %vm1339_vm4, %v1531_v42, -inf  ;;  %v1521_v50 = vpop.f32.mrb[6].mxu1  ;;  %v1542_v54 = vsel %vm1339_vm4, %v1532_v45, -inf }
 0x41a   : >> { %1540 = vmax.xlane.f32.xlu1 %v1539_v48  ;;  %v2555_v51 = vpop.f32.mrb[7].mxu0  ;;  %v2561_v52 = vpop.f32.mrb[7].mxu1 }
 0x41e   : >> { %1543 = vmax.xlane.f32.xlu1 %v1542_v54 }
 0x49f   : >> { %v1535_v22 = vpop.xlane.xlu0 %1534 }
 0x4a0   : >> { %v3687_v23 = vmax.f32 %v3142_v16, %v1535_v22  }
 0x4a2   : >> { %v1549_v24 = vsub.f32 %v3142_v16, %v3687_v23  ;;  %v1561_v26 = vsub.f32 %v1529_v30, %v3687_v23 }
 0x4a3   : >> { %v1538_v27 = vpop.xlane.xlu0 %1537 }
 0x4a4   : >> { %v1565_v28 = vmul.f32 1.442695, %v1561_v26  ;;  %v3693_v29 = vmax.f32 %v3138_v15, %v1538_v27   ;;  %v1553_v54 = vmul.f32 1.442695, %v1549_v24 }
 0x4a6   : >> { %v1550_v31 = vsub.f32 %v3138_v15, %v3693_v29  ;;  %v1562_v33 = vsub.f32 %v1530_v32, %v3693_v29  ;;  %2832 = vpow2.f32 %v1565_v28 }
 0x4a7   : >> { %v1541_v34 = vpop.xlane.xlu1 %1540 }
 0x4a8   : >> { %v1567_v35 = vmul.f32 1.442695, %v1562_v33  ;;  %v3699_v36 = vmax.f32 %v3134_v14, %v1541_v34   ;;  %v1555_v55 = vmul.f32 1.442695, %v1550_v31 }
 0x4aa   : >> { %v1551_v16 = vsub.f32 %v3134_v14, %v3699_v36  ;;  %v1563_v30 = vsub.f32 %v1531_v42, %v3699_v36  ;;  %2834 = vpow2.f32 %v1567_v35 }
 0x4ab   : >> { %v1544_v37 = vpop.xlane.xlu1 %1543 }
 0x4ac   : >> { %v1569_v38 = vmul.f32 1.442695, %v1563_v30  ;;  %v3705_v39 = vmax.f32 %v3130_v13, %v1544_v37   ;;  %v1557_v56 = vmul.f32 1.442695, %v1551_v16 }
 0x4ae   : >> { %v1552_v15 = vsub.f32 %v3130_v13, %v3705_v39  ;;  %v1564_v32 = vsub.f32 %v1532_v45, %v3705_v39  ;;  %2836 = vpow2.f32 %v1569_v38 }
 0x4b0   : >> { %v1571_v40 = vmul.f32 1.442695, %v1564_v32  ;;  %v2833_v41 = vpop.eup %2832 }
 0x4b1   : >> { %v1577_v44 = vsel %vm1339_vm4, %v2833_v41, 0.0  ;;  %v1597_v46 = vpack.c.bf16 %v2833_v41, %v2833_v41 }
 0x4b2   : >> { %2838 = vpow2.f32 %v1571_v40  ;;  %1578 = vadd.xlane.f32.xlu0 %v1577_v44 }
 0x4b3   : >> { %2565 = vmatmul.mubr.msk.bf16.vlgmr.msra.gmra.mrb[8].mxu0 %vm1339_vm4, %v1597_v46  ;;  %2840 = vpow2.f32 %v1553_v54 }
 0x4b4   : >> { %v2835_v14 = vpop.eup %2834  ;;  %2575 = vmatpush3.bf16.msra.mxu0 %v1698_v19  ;;  %2576 = vmatprep.mubr.msk.bf16.mxu0 %vm3159_vm3, %v3158_v43  ;;  %2842 = vpow2.f32 %v1555_v55 }
 0x4b5   : >> { %v1580_v42 = vsel %vm1339_vm4, %v2835_v14, 0.0  ;;  %v1598_v13 = vpack.c.bf16 %v2835_v14, %v2835_v14  ;;  %2844 = vpow2.f32 %v1557_v56  ;;  %2602 = vmatprep.subr.bf16.mxu0 (%p3731_p13), %v3151_v9 }
 0x4b6   : >> { %1581 = vadd.xlane.f32.xlu1 %v1580_v42 }
 0x4b7   : >> { %2571 = vmatmul.mubr.msk.bf16.vlgmr.msra.gmra.mrb[8].mxu1 %vm1339_vm4, %v1598_v13 }
 0x4b8   : >> { %v2837_v45 = vpop.eup %2836  ;;  %2581 = vmatpush3.bf16.msra.mxu1 %v1744_v21  ;;  %2582 = vmatprep.mubr.msk.bf16.mxu1 %vm3159_vm3, %v3158_v43  ;;  %v1559_v43 = vmul.f32 1.442695, %v1552_v15 }
 0x4b9   : >> { %v1583_v47 = vsel %vm1339_vm4, %v2837_v45, 0.0  ;;  %v1599_v48 = vpack.c.bf16 %v2837_v45, %v2837_v45  ;;  %2586 = vmatprep.subr.bf16.mxu1 (%p3731_p13), %v3151_v9 }
 0x4ba   : >> { %1584 = vadd.xlane.f32.xlu0 %v1583_v47  ;;  %2846 = vpow2.f32 %v1559_v43 }
 0x4bb   : >> { %2577 = vmatmul.mubr.msk.bf16.vlgmr.msra.gmra.mrb[12].mxu0 %vm1339_vm4, %v1599_v48 }
 0x4bc   : >> { %v2839_v50 = vpop.eup %2838  ;;  %2618 = vmatprep.mubr.msk.bf16.mxu0 (%p3731_p13), %vm3152_vm1, %v3151_v9 }
 0x4bd   : >> { %v1586_v51 = vsel %vm1339_vm4, %v2839_v50, 0.0  ;;  %v1600_v52 = vpack.c.bf16 %v2839_v50, %v2839_v50  ;;  %v2841_v57 = vpop.eup %2840 }
 0x4be   : >> { %1587 = vadd.xlane.f32.xlu1 %v1586_v51  ;;  %v1573_v17 = vmul.f32 %v3126_v12, %v2841_v57  ;;  %v2843_v18 = vpop.eup %2842  ;;  %v1593_v16 = vmul.f32 %v3110_v7, %v2841_v57  ;;  %v2848_v57 = vld [vmem:[%s3930_s9] sm:$0xff] (%p3731_p13)  }
 0x4bf   : >> { %2583 = vmatmul.mubr.msk.bf16.vlgmr.msra.gmra.mrb[12].mxu1 %vm1339_vm4, %v1600_v52  ;;  %v1574_v21 = vmul.f32 %v3122_v11, %v2843_v18  ;;  %v2845_v22 = vpop.eup %2844  ;;  %v1594_v11 = vmul.f32 %v3106_v6, %v2843_v18 }
 0x4c0   : >> { %v1575_v24 = vmul.f32 %v3118_v10, %v2845_v22  ;;  %v1595_v14 = vmul.f32 %v3102_v5, %v2845_v22  ;;  %2590 = vmatprep.mubr.msk.bf16.mxu1 (%p3731_p13), %vm3152_vm1, %v3151_v9  ;;  %2587 = vmatpush3.bf16.msra.mxu1 (%p3731_p13), %v2848_v57  ;;  %v2857_v57 = vld [vmem:[%s3936_s15 + $0x28] sm:$0xff] (%p3731_p13)  }
 0x4c1   : > { %2588 = vmatprep.subr.bf16.mxu1 (%p3731_p13), %v3151_v9 }
 0x4c4   : >> { %v2847_v28 = vpop.eup %2846 }
 0x4c5   : >> { %v1576_v34 = vmul.f32 %v3114_v8, %v2847_v28  ;;  %v1596_v7 = vmul.f32 %v3098_v4, %v2847_v28 }
 0x53f   : >> { %v1579_v19 = vpop.xlane.xlu0 %1578 }
 0x540   : >> { %v1589_v20 = vadd.f32 %v1579_v19, %v1573_v17  }
 0x542   : > { %2860 = vrcp.f32 (%p3731_p13), %v1589_v20 }
 0x543   : >> { %v1582_v26 = vpop.xlane.xlu1 %1581 }
 0x544   : >> { %v1590_v27 = vadd.f32 %v1582_v26, %v1574_v21  }
 0x546   : > { %2862 = vrcp.f32 (%p3731_p13), %v1590_v27 }
 0x547   : >> { %v1585_v31 = vpop.xlane.xlu0 %1584 }
 0x548   : >> { %v1591_v33 = vadd.f32 %v1585_v31, %v1575_v24   ;;  %v2849_v24 = vld [vmem:[%s3930_s9 + $0x8] sm:$0xff] (%p3731_p13)  }
 0x549   : > { %2589 = vmatpush3.bf16.msra.mxu1 (%p3731_p13), %v2849_v24 }
 0x54a   : > { %2864 = vrcp.f32 (%p3731_p13), %v1591_v33  ;;  %2594 = vmatprep.subr.bf16.mxu1 (%p3731_p13), %v3151_v9 }
 0x54b   : >> { %v1588_v35 = vpop.xlane.xlu1 %1587 }
 0x54c   : >> { %v1592_v30 = vadd.f32 %v1588_v35, %v1576_v34  }
 0x54e   : > { %2866 = vrcp.f32 (%p3731_p13), %v1592_v30 }
 0x586   : >> { %v1642_v12 = vpop.f32.mrb[8].mxu0 }
 0x587   : >> { %v1786_v37 = vadd.f32 %v1642_v12, %v1593_v16   ;;  %v2566_v38 = vpop.f32.mrb[9].mxu0  ;;  %v3985_v12 = vmov %v1589_v20  ;;  %v3989_v16 = vmov %v3687_v23 }
 0x588   : >> { %v1645_v15 = vpop.f32.mrb[10].mxu0 }
 0x589   : >> { %v2567_v32 = vpop.f32.mrb[11].mxu0  ;;  %v3988_v15 = vmov %v3693_v29  ;;  %v2861_v29 = vpop.eup (%p3731_p13), %2860 }
 0x58a   : >> { %v1688_v40 = vpop.f32.mrb[8].mxu1  ;;  %v2863_v23 = vpop.eup (%p3731_p13), %2862 }
 0x58b   : >> { %v1787_v41 = vadd.f32 %v1688_v40, %v1594_v11   ;;  %v2572_v44 = vpop.f32.mrb[9].mxu1  ;;  %v3984_v11 = vmov %v1590_v27 }
 0x58c   : >> { %v1691_v10 = vpop.f32.mrb[10].mxu1 }
 0x58d   : >> { %v2573_v46 = vpop.f32.mrb[11].mxu1  ;;  %v3980_v6 = vmov %v1787_v41  ;;  %v3983_v10 = vmov %v1591_v33  ;;  %v1795_v55 = vmul.f32 (%p3731_p13), %v2863_v23, %v1787_v41 }
 0x58e   : >> { %v1734_v42 = vpop.f32.mrb[12].mxu0 }
 0x58f   : >> { %v1788_v45 = vadd.f32 %v1734_v42, %v1595_v14   ;;  %v2578_v8 = vpop.f32.mrb[13].mxu0  ;;  %v3987_v14 = vmov %v3699_v36  ;;  %1311 = sbr.rel (!%p3731_p13) target bundleno = 815 (0x32f), region = 147  ;;  %v1794_v36 = vmul.f32 (%p3731_p13), %v2861_v29, %v1786_v37 }
 0x590   : >> { %v1737_v13 = vpop.f32.mrb[14].mxu0  ;;  %v3982_v8 = vmov %v1592_v30 }
 0x591   : >> { %v2579_v47 = vpop.f32.mrb[15].mxu0  ;;  %v3979_v5 = vmov %v1788_v45  ;;  %v3986_v13 = vmov %v3705_v39  ;;  %v2865_v39 = vpop.eup (%p3731_p13), %2864  ;;  %v2451_v8 = vld [vmem:[%s3931_s10] ss:$0 sm:$0xff] (%p3731_p13) }
 0x592   : >> { %v1780_v48 = vpop.f32.mrb[12].mxu1  ;;  %v2867_v56 = vpop.eup (%p3731_p13), %2866  ;;  %v1796_v25 = vmul.f32 (%p3731_p13), %v2865_v39, %v1788_v45 }
 0x593   : >> { %v1789_v50 = vadd.f32 %v1780_v48, %v1596_v7   ;;  %v2584_v51 = vpop.f32.mrb[13].mxu1  ;;  %v3981_v7 = vmov %v1786_v37 }
 0x594   : >> { %v1783_v52 = vpop.f32.mrb[14].mxu1  ;;  %v1798_v58 = vcombine.low (%p3731_p13), %v1794_v36, %v1796_v25  ;;  %v1799_v60 = vcombine.high (%p3731_p13), %v1794_v36, %v1796_v25 }
 0x595   : >> { %v2585_v54 = vpop.f32.mrb[15].mxu1  ;;  %v3978_v4 = vmov %v1789_v50  ;;  %v1797_v49 = vmul.f32 (%p3731_p13), %v2867_v56, %v1789_v50  ;;  %v2852_v56 = vld [vmem:[%s3936_s15] sm:$0xff] (%p3731_p13)  }
 0x596   : > { %v1806_v63 = vrot.slane %v1798_v58, %v3473_v53  ;;  %v1813_v1 = vrot.slane %v1799_v60, %v3473_v53  ;;  %2603 = vmatpush3.bf16.msra.mxu0 %v2852_v56 }
 0x597   : > { %v1814_v61 = vcombine.low %v1795_v55, %v1797_v49  ;;  %v1815_v62 = vcombine.high %v1795_v55, %v1797_v49  ;;  %v2850_v55 = vld [vmem:[%s3934_s13] sm:$0xff]   ;;  %2604 = vmatprep.subr.bf16.mxu0 %v3151_v9 }
 0x599   : > { %v1822_v2 = vrot.slane %v1814_v61, %v3473_v53  ;;  %v1829_v3 = vrot.slane %v1815_v62, %v3473_v53  ;;  %v2455_v61 = vld [vmem:[%s3932_s11] ss:$0 sm:$0xff] }
 0x59b   : > { %v1830_v4 = vcombine.low %v1806_v63, %v1822_v2  ;;  %v1831_v5 = vcombine.high %v1806_v63, %v1822_v2  ;;  %v1846_v6 = vcombine.low %v1813_v1, %v1829_v3  ;;  %v1847_v43 = vcombine.high %v1813_v1, %v1829_v3  ;;  %v2456_v63 = vld [vmem:[%s3933_s12] ss:$0 sm:$0xff] }
 0x59d   : > { %v1838_v17 = vrot.slane %v1830_v4, %v3476_v59  ;;  %v1845_v18 = vrot.slane %v1831_v5, %v3476_v59  ;;  %v1854_v19 = vrot.slane %v1846_v6, %v3476_v59  ;;  %v1861_v20 = vrot.slane %v1847_v43, %v3476_v59  ;;  %v2853_v4 = vld [vmem:[%s3936_s15 + $0x8] sm:$0xff]   ;;  %v2854_v5 = vld [vmem:[%s3936_s15 + $0x10] sm:$0xff]   ;;  %v2855_v6 = vld [vmem:[%s3936_s15 + $0x18] sm:$0xff]  }
 0x59e   : > { %2605 = vmatpush3.bf16.msra.mxu0 %v2853_v4  ;;  %v2856_v43 = vld [vmem:[%s3936_s15 + $0x20] sm:$0xff]  }
 0x59f   : > { %v1866_v21 = vcombine.low %v1838_v17, %v1845_v18  ;;  %v2449_v22 = vcombine.high %v1838_v17, %v1845_v18  ;;  %v1882_v26 = vcombine.low %v1854_v19, %v1861_v20  ;;  %v2450_v27 = vcombine.high %v1854_v19, %v1861_v20  ;;  %2606 = vmatprep.subr.bf16.mxu0 %v3151_v9  ;;  %v2858_v17 = vld [vmem:[%s3936_s15 + $0x30] sm:$0xff]   ;;  %v2859_v18 = vld [vmem:[%s3936_s15 + $0x38] sm:$0xff]   ;;  %v2457_v19 = vld [vmem:[%s3935_s14] ss:$0 sm:$0xff] }
 0x5a1   : > { %v1873_v28 = vrot.slane %v1866_v21, %v3473_v53  ;;  %v1881_v31 = vrot.slane %v2449_v22, %v3473_v53  ;;  %v1889_v33 = vrot.slane %v1882_v26, %v3473_v53  ;;  %v1897_v34 = vrot.slane %v2450_v27, %v3473_v53 }
 0x5a2   : > { %2607 = vmatpush3.bf16.msra.mxu0 %v2854_v5 }
 0x5a3   : > { %v1898_v35 = vcombine.low %v1873_v28, %v1881_v31  ;;  %v1914_v30 = vcombine.low %v1889_v33, %v1897_v34  ;;  %v1899_v16 = vcombine.high %v1873_v28, %v1881_v31  ;;  %v1915_v12 = vcombine.high %v1889_v33, %v1897_v34  ;;  %2608 = vmatprep.subr.bf16.mxu0 %v3151_v9 }
 0x5a5   : > { %v1906_v37 = vrot.slane %v1898_v35, %v3476_v59  ;;  %v1922_v38 = vrot.slane %v1914_v30, %v3476_v59  ;;  %v1913_v15 = vrot.slane %v1899_v16, %v3476_v59  ;;  %v1929_v32 = vrot.slane %v1915_v12, %v3476_v59 }
 0x5a6   : > { %2609 = vmatpush3.bf16.msra.mxu0 %v2855_v6 }
 0x5a7   : > { %v1931_v11 = vcombine.high %v1906_v37, %v1922_v38  ;;  %v1933_v40 = vcombine.high %v1913_v15, %v1929_v32  ;;  %v1930_v41 = vcombine.low %v1906_v37, %v1922_v38  ;;  %v1932_v53 = vcombine.low %v1913_v15, %v1929_v32  ;;  %2610 = vmatprep.subr.bf16.mxu0 %v3151_v9  ;;  %v2461_v37 = vld [vmem:[%s3990_s17] ss:$0 sm:$0xff] }
 0x5a9   : > { %1935 = vrot.lane.b32.xlu0 %v1931_v11, %s3160_s28  ;;  %1943 = vrot.lane.b32.xlu1 %v1933_v40, %s3161_s1  ;;  %s3992_s28 = sld [smem:[#allocation26_spill]] }
 0x5aa   : > { %2611 = vmatpush3.bf16.msra.mxu0 %v2856_v43 }
 0x5ab   : > { %2612 = vmatprep.subr.bf16.mxu0 %v3151_v9 }
 0x5ad   : > { %1939 = vrot.lane.b32.xlu0 %v1932_v53, %s3162_s0 }
 0x5ae   : > { %2613 = vmatpush3.bf16.msra.mxu0 %v2857_v57 }
 0x5af   : > { %2614 = vmatprep.subr.bf16.mxu0 %v3151_v9  ;;  %s3993_s1 = smov %s3992_s28  ;;  %s3869_s0 = scalar_lea.hbm %s3992_s28, %s2471_s19 }
 0x5b2   : > { %2615 = vmatpush3.bf16.msra.mxu0 %v2858_v17 }
 0x5b3   : > { %2616 = vmatprep.subr.bf16.mxu0 %v3151_v9 }
 0x5b6   : > { %2617 = vmatpush3.bf16.msra.mxu0 %v2859_v18 }
 0x61b   : > { %v1936_v44 = vpop.permute.xlu0 %1935  ;;  %v1944_v10 = vpop.permute.xlu1 %1943 }
 0x61c   : > { %v1947_v46 = vsel %vm1339_vm4, %v1930_v41, %v1936_v44 }
 0x61f   : > { %v1940_v14 = vpop.permute.xlu0 %1939 }
 0x620   : > { %v1949_v42 = vsel %vm1948_vm7, %v1947_v46, %v1940_v14 }
 0x621   : > { %v1951_v45 = vsel %vm1950_vm8, %v1949_v42, %v1944_v10 }
 0x622   : > { %v1952_v59 = vpack.c.bf16 %v1951_v45, %v1951_v45 }
 0x624   : > { %2591 = vmatmul.mubr.msk.bf16.vlgmr.msra.gmra.mrb[0].mxu1 %vm612_vm0, %v1952_v59 }
 0x625   : > { %2598 = vmatprep.mubr.msk.bf16.mxu1 %vm3152_vm1, %v3151_v9  ;;  %2595 = vmatpush3.bf16.msra.mxu1 %v2850_v55 }
 0x626   : > { %2596 = vmatprep.subr.bf16.mxu1 %v3151_v9 }
 0x6f7   : > { %v2013_v13 = vpop.f32.mrb[0].mxu1 }
 0x6f8   : > { %v2014_v47 = vadd.f32 %v2451_v8, %v2013_v13  ;;  %v2592_v7 = vpop.f32.mrb[1].mxu1 }
 0x6f9   : > { %v2016_v48 = vpop.f32.mrb[2].mxu1 }
 0x6fa   : > { %v3805_v50 = vadd.f32 %v2014_v47, %v3408_v0  ;;  %v2593_v51 = vpop.f32.mrb[3].mxu1  ;;  %v2851_v0 = vld [vmem:[%s3934_s13 + $0x8] sm:$0xff]  }
 0x6fb   : > { %2597 = vmatpush3.bf16.msra.mxu1 %v2851_v0 }
 0x6fc   : > { %v2022_v52 = vsel %vm612_vm0, %v3805_v50, 0.0 }
 0x6fd   : > { %2023 = vadd.xlane.f32.xlu1 %v2022_v52 }
 0x78a   : > { %v2024_v54 = vpop.xlane.xlu1 %2023 }
 0x78b   : > { %v2025_v29 = vmul.f32 0.03125, %v2024_v54 }
 0x78d   : > { %v2026_v23 = vsub.f32 %v3805_v50, %v2025_v29 }
 0x78f   : > { %v2027_v36 = vmul.f32 %v2026_v23, %v2026_v23 }
 0x791   : > { %v2028_v39 = vsel %vm612_vm0, %v2027_v36, 0.0 }
 0x792   : > { %2029 = vadd.xlane.f32.xlu0 %v2028_v39 }
 0x81f   : > { %v2030_v25 = vpop.xlane.xlu0 %2029 }
 0x820   : > { %v2031_v49 = vmul.f32 0.03125, %v2030_v25 }
 0x822   : > { %v2032_v58 = vadd.f32 1e-05, %v2031_v49 }
 0x824   : > { %2868 = vrsqrt.f32 %v2032_v58 }
 0x82e   : > { %v2869_v60 = vpop.eup %2868 }
 0x82f   : > { %v2034_v62 = vmul.f32 %v2869_v60, %v2026_v23 }
 0x831   : > { %v2041_v1 = vmul.f32 %v2455_v61, %v2034_v62 }
 0x833   : > { %v2048_v2 = vadd.f32 %v2456_v63, %v2041_v1 }
 0x835   : > { %v2049_v3 = vpack.c.bf16 %v2048_v2, %v2048_v2 }
 0x837   : > { %2599 = vmatmul.mubr.msk.bf16.vlgmr.msra.gmra.mrb[4].mxu1 %vm612_vm0, %v2049_v3 }
 0x90a   : > { %v2110_v20 = vpop.f32.mrb[4].mxu1 }
 0x90b   : > { %v2111_v21 = vadd.f32 %v2457_v19, %v2110_v20  ;;  %v2600_v22 = vpop.f32.mrb[5].mxu1 }
 0x90c   : > { %v2113_v26 = vpop.f32.mrb[6].mxu1 }
 0x90d   : > { %v2117_v27 = vmul.f32 0.044715, %v2111_v21  ;;  %v2601_v24 = vpop.f32.mrb[7].mxu1  ;;  %v2116_v9 = vmul.f32 0.5, %v2111_v21 }
 0x90f   : > { %v2118_v28 = vmul.f32 %v2117_v27, %v2111_v21 }
 0x911   : > { %v2119_v31 = vmul.f32 %v2118_v28, %v2111_v21 }
 0x913   : > { %v2120_v33 = vadd.f32 %v2119_v31, %v2111_v21 }
 0x915   : > { %v2121_v34 = vmul.f32 0.7978846, %v2120_v33 }
 0x917   : > { %2870 = vtanh.f32 %v2121_v34 }
 0x921   : > { %v2871_v35 = vpop.eup %2870 }
 0x922   : > { %v2123_v30 = vadd.f32 1.0, %v2871_v35 }
 0x924   : > { %v2124_v16 = vmul.f32 %v2123_v30, %v2116_v9 }
 0x926   : > { %v2125_v12 = vpack.c.bf16 %v2124_v16, %v2124_v16 }
 0x928   : > { %2619 = vmatmul.mubr.bf16.vlgmr.msra.gmra.mrb[0].mxu0 %v2125_v12 }
 0x9fb   : > { %v2231_v38 = vpop.f32.mrb[0].mxu0 }
 0x9fc   : > { %v2232_v15 = vadd.f32 %v2461_v37, %v2231_v38  ;;  %v2620_v32 = vpop.f32.mrb[1].mxu0 }
 0x9fd   : > { %v2234_v11 = vpop.f32.mrb[2].mxu0 }
 0x9fe   : > { %v2237_v40 = vadd.f32 %v2232_v15, %v3805_v50  ;;  %v2621_v41 = vpop.f32.mrb[3].mxu0 }
 0xa00   : > { %2238 = vst.msk [vmem:[%s599_s21] sm:$0xff] %vm612_vm0, %v2237_v40 }
 0xa01   : > { %2969 = shalt.err (!%p2966_p7)
}
 0xa02   : > { %s2970_s24 = scalar_lea.hbm %s3869_s0, 128  ;;  %s2974_s17 = scalar_lea.hbm %s3993_s1, 256 }
 0xa03   : > { %p2971_p9 = scmp.ne.s32.totalorder %s3869_s0, %s2970_s24  ;;  %p2975_p2 = scmp.lt.u32.totalorder %s3869_s0, %s3993_s1 }
 0xa04   : > { %p2976_p1 = scmp.lt.u32.totalorder %s2974_s17, %s2970_s24  ;;  %p2978_p4 = scmp.lt.u32.totalorder %s2970_s24, %s3869_s0 }
 0xa05   : > { %p2972_p12 = pnand %p2971_p9, %p3994_p8 }
 0xa06   : > { %p2977_p13 = por %p2976_p1, %p2975_p2 }
 0xa07   : > { %p2973_p0 = pneg %p2972_p12 }
 0xa08   : > { %p2979_p10 = por %p2978_p4, %p2977_p13 }
 0xa0a   : > { %p2980_p11 = pnand %p2979_p10, %p2973_p0 }
 0xa0c   : > { %2983 = shalt.err (!%p2980_p11)
}
 0xa0d   : > { %2634 = dma.vmem_to_hbm [thread:$0]  (%p3994_p8), %s3871_s22, 128, %s3869_s0, %s2240_s27  }
 0xa0e PF: > { %s3995_s20 = sld [smem:[#allocation17_spill]]  ;;  %s3996_s28 = sld [smem:[#allocation14_spill]] }
 0xa0f   : > { %s3997_s6 = sld [smem:[#allocation20_spill]] }
 0xa14   : > { %p2656_p3 = scmp.ge.s32.totalorder %s3995_s20, 2  ;;  %s2266_s18 = sand.u32 1, %s3996_s28  }
 0xa15   : > { %p3998_p5 = scmp.ne.s32.totalorder %s3997_s6, 0  ;;  %s2267_s23 = scalar_lea.sflag [#allocation6], %s2266_s18 }
 0xa17   : > { %p2647_p6 = pnand %p2656_p3, %p3998_p5 }
 0xa19   : > { %3069 = dma.done.wait (!%p2647_p6), %s2267_s23, 128  }
 0xa1a   : > { %3071 = vsyncadd (!%p2647_p6), %s2267_s23, 4294967168  ;;  %s32_s29 = sadd.s32 1, %s3995_s20   ;;  %s3999_s30 = sld [smem:[#allocation15_spill]] }
 0xa1b   : > { %p29_p7 = scmp.ge.s32.totalorder %s32_s29, 4   ;;  %s4000_s26 = sld [smem:[#allocation21_spill]] }
 0xa1c   : > { %s4001_s27 = sld [smem:[#allocation16_spill]]  ;;  %s4002_s28 = sld [smem:[#allocation18_spill]] }
 0xa1d   : > { %s4003_s24 = smov %s3078_s25  ;;  %31 = sbr.rel (!%p29_p7) target bundleno = 12 (0xc), region = 158 }
 0xa20   : > { %s4004_s25 = smov %s3999_s30 }
 0xa24   :  { %2272 = vsyncpa [#allocation5], 1 }
 0xa25   :  { %2274 = vsyncpa [#allocation5 + $0x1], 1 }
 0xa26   :  { %2275 = vsyncpa [#allocation8], 1 }
 0xa27   :  { %2276 = vsyncpa [#allocation6], 1 }
 0xa28   :  { %2278 = vsyncpa [#allocation6 + $0x1], 1 }

</bundles_post_ra>
